<compile_context>
chip_gen: v5e
topology: v5e:2x2
jax: 0.10.0
libtpu: 0.0.40
codegen_flags: <defaults>
</compile_context>

<pallas_src>
import functools

import jax
import jax.numpy as jnp
from jax.experimental import pallas as pl
from jax.experimental.pallas import tpu as pltpu


# ----------------------------------------------------------------------------------------
# Kernel 1: fused per-node projection + attention logits for all heads (runs once).
# TODO(synk): row-block this kernel too once N*F_in no longer fits whole in VMEM.
# ----------------------------------------------------------------------------------------
def gat_project_kernel(x_ref, w_ref, a_ref, h_all_ref, e_src_ref, e_dst_t_ref,
                       *, heads, matmul_dtype):
    x = x_ref[...].astype(matmul_dtype)               # (N, F_in)
    w = w_ref[...].astype(matmul_dtype)               # (F_in, H*F_out), col block h == W[h]
    h_all = jnp.dot(x, w, preferred_element_type=jnp.float32)          # (N, H*F_out)

    a_cat = a_ref[...].astype(matmul_dtype)           # (H*F_out, 2H) block-diag [a_src|a_dst]
    e_all = jnp.dot(h_all.astype(matmul_dtype), a_cat,
                    preferred_element_type=jnp.float32)                # (N, 2H)

    h_all_ref[...] = h_all
    e_src_ref[...] = e_all[:, :heads]                 # (N, H): varies along src rows
    e_dst_t_ref[...] = jnp.transpose(e_all[:, heads:])  # (H, N): dst logits, lane oriented
                                                         # (one tiny XLU relayout, once)


# ----------------------------------------------------------------------------------------
# Kernel 2: row-blocked masked softmax + spmm over source-node tiles (the N^2 work).
# ----------------------------------------------------------------------------------------
def gat_attention_kernel(adj_ref, e_src_ref, h_all_ref, e_dst_t_ref, hmask_ref, o_ref,
                         *, heads, matmul_dtype):
    # int8 adjacency tile widened in-kernel; only the -1e9 additive bias masks the softmax.
    adj = adj_ref[...].astype(jnp.float32)             # (TILE_M, N)
    bias = (adj - 1.0) * jnp.float32(1e9)              # 0 on-edge, -1e9 off-edge (hoisted)
    has_edge = jnp.max(adj, axis=1, keepdims=True)     # (TILE_M, 1): keeps spmm's zero rows

    e_src = e_src_ref[...]                             # (TILE_M, H)   this tile's sources
    e_dst_t = e_dst_t_ref[...]                         # (H, N)        all destinations
    h_all = h_all_ref[...].astype(matmul_dtype)        # (N, H*F_out)  spmm RHS (resident)
    head_mask = hmask_ref[...]                         # (H, H*F_out)

    out = jnp.zeros(o_ref.shape, jnp.float32)          # (TILE_M, H*F_out) accumulator
    for h in range(heads):                             # H small & static -> fully unrolled
        # alpha_e = LeakyReLU(a_src.h_i + a_dst.h_j); LeakyReLU(0.2) == max(x, 0.2x)
        s = e_src[:, h:h + 1] + e_dst_t[h:h + 1, :]    # (TILE_M, N) outer sum
        s = jnp.maximum(s, 0.2 * s) + bias             # masked logits
        # sparse softmax grouped by edge source == masked row softmax
        row_max = jnp.max(s, axis=1, keepdims=True)    # scatter_max equivalent
        ex = jnp.exp(s - row_max)                      # off-edge: exp(~-1e9) == 0 exactly
        denom = jnp.sum(ex, axis=1, keepdims=True) + 1e-16   # scatter_add equivalent
        inv = pl.reciprocal(denom, approx=True)        # EUP vrcp (otherwise-idle slot)
        inv = inv * (2.0 - denom * inv)                # one Newton step -> ~f32-exact
        attn = (ex * inv).astype(matmul_dtype)         # (TILE_M, N)
        # spmm for head h: full-width dot, mask the small RESULT (TILE_M x HF) instead of
        # the (N x HF) RHS -- head-h columns of the product only depend on head-h RHS cols.
        out = out + jnp.dot(attn, h_all, preferred_element_type=jnp.float32) \
                    * head_mask[h:h + 1, :]

    o_ref[...] = (out * has_edge).astype(o_ref.dtype)  # single lane-dense store per tile


def _pick_tile_m(n: int) -> int:
    """Source-row tile: ~256 rows target (sized for v7x's 32 MiB default-scoped VMEM with a
    double-buffered int8 (TILE_M, N) adjacency tile); multiples of 32 keep int8 sublane
    packing legal; tiny graphs fall back to the full dimension."""
    if n % 256 == 0 and n > 256:
        return 256
    for t in (128, 64, 32):
        if n % t == 0 and n > t:
            return t
    return n


@functools.partial(jax.jit, static_argnames=("matmul_dtype",))
def graph_att_conv(x, adj_mask, W, A, *, matmul_dtype=jnp.float32):
    """x: (N, F_in), adj_mask: (N, N) 0/1, W: (H, F_in, F_out), A: (H, 2*F_out)
       -> (N, H*F_out)  (== torch.cat([head_h(x, adj) for h], dim=1), eval mode)

    matmul_dtype: keep jnp.float32 to match the f32 torch module; use jnp.bfloat16 on
    v6e/v7x (and for the dots only on v5e) at realistic sizes for 2x MXU rate."""
    N, F_in = x.shape
    H, _, F_out = W.shape
    HF = H * F_out

    # Host/XLA-side parameter packing so the kernels run fused, lane-dense matmuls.
    w_flat = jnp.transpose(W, (1, 0, 2)).reshape(F_in, HF)          # col block h == W[h]
    a_src, a_dst = A[:, :F_out], A[:, F_out:]
    eye = jnp.eye(H, dtype=jnp.float32)
    a_src_cols = (a_src[:, :, None] * eye[:, None, :]).reshape(HF, H)
    a_dst_cols = (a_dst[:, :, None] * eye[:, None, :]).reshape(HF, H)
    a_cat = jnp.concatenate([a_src_cols, a_dst_cols], axis=1)       # (HF, 2H)
    head_mask = jnp.repeat(eye, F_out, axis=1)                      # (H, HF)

    # Adjacency compressed to int8 in HBM: 4x less traffic on the only N^2 operand
    # (the HBM roofline on v5e/v6e at realistic N).
    adj_i8 = (adj_mask > 0).astype(jnp.int8)

    vmem_cap = 32 * 1024 * 1024   # explicit scoped-VMEM cap (>= default on all gens,
                                  # <= v7x's 64 MiB physical)

    # --- kernel 1: projection + attention logits, all heads fused (gridless, runs once) ---
    h_all, e_src, e_dst_t = pl.pallas_call(
        functools.partial(gat_project_kernel, heads=H, matmul_dtype=matmul_dtype),
        out_shape=(jax.ShapeDtypeStruct((N, HF), jnp.float32),
                   jax.ShapeDtypeStruct((N, H), jnp.float32),
                   jax.ShapeDtypeStruct((H, N), jnp.float32)),
        in_specs=[pl.BlockSpec(memory_space=pltpu.MemorySpace.VMEM) for _ in range(3)],
        out_specs=tuple(pl.BlockSpec(memory_space=pltpu.MemorySpace.VMEM) for _ in range(3)),
        compiler_params=pltpu.CompilerParams(vmem_limit_bytes=vmem_cap),
    )(x, w_flat, a_cat)

    # --- kernel 2: row-blocked masked softmax + spmm over the adjacency ---
    tile_m = _pick_tile_m(N)
    grid = (N // tile_m,)
    out = pl.pallas_call(
        functools.partial(gat_attention_kernel, heads=H, matmul_dtype=matmul_dtype),
        out_shape=jax.ShapeDtypeStruct((N, HF), jnp.float32),
        grid_spec=pltpu.PrefetchScalarGridSpec(
            num_scalar_prefetch=0,
            grid=grid,
            in_specs=[
                pl.BlockSpec((tile_m, N), lambda i: (i, 0)),   # int8 adjacency row tile
                pl.BlockSpec((tile_m, H), lambda i: (i, 0)),   # e_src rows for this tile
                pl.BlockSpec((N, HF), lambda i: (0, 0)),       # h_all      (VMEM resident)
                pl.BlockSpec((H, N), lambda i: (0, 0)),        # e_dst_t    (VMEM resident)
                pl.BlockSpec((H, HF), lambda i: (0, 0)),       # head mask  (VMEM resident)
            ],
            out_specs=pl.BlockSpec((tile_m, HF), lambda i: (i, 0)),
        ),
        compiler_params=pltpu.CompilerParams(
            dimension_semantics=("parallel",),                 # 2x on v7x megacore
            vmem_limit_bytes=vmem_cap,
        ),
    )(adj_i8, e_src, h_all, e_dst_t, head_mask)
    return out


def graph_att_conv_ref(x, adj_mask, W, A):
    """Plain-JAX reference (masked-softmax formulation of the sparse GAT forward)."""
    H, _, F_out = W.shape
    hp = jax.lax.Precision.HIGHEST
    outs = []
    for h in range(H):
        hW = jnp.dot(x, W[h], precision=hp)
        e_i = jnp.dot(hW, A[h, :F_out], precision=hp)
        e_j = jnp.dot(hW, A[h, F_out:], precision=hp)
        s = e_i[:, None] + e_j[None, :]
        s = jnp.where(s > 0, s, 0.2 * s)
        mask = adj_mask > 0
        has_edge = jnp.any(mask, axis=1, keepdims=True)
        rmax = jnp.max(jnp.where(mask, s, -jnp.inf), axis=1, keepdims=True)
        rmax = jnp.where(has_edge, rmax, 0.0)
        ex = jnp.where(mask, jnp.exp(s - rmax), 0.0)
        attn = ex / (ex.sum(axis=1, keepdims=True) + 1e-16)
        outs.append(jnp.dot(attn, hW, precision=hp))
    return jnp.concatenate(outs, axis=1)


if __name__ == "__main__":
    # Small shapes consistent with GraphAttConv(in_features=32, out_features=32, heads=4).
    # N = 128 keeps the (.., N) vector work lane-dense and exercises the row-blocked grid
    # (TILE_M = 64 -> grid of 2) while staying tiny.
    N = 128
    F_IN = 32
    HEADS = 4
    OUT_FEATURES = 32
    F_OUT = OUT_FEATURES // HEADS   # out_perhead = 8

    key = jax.random.PRNGKey(0)
    k_x, k_adj, k_w, k_a = jax.random.split(key, 4)

    x = jax.random.normal(k_x, (N, F_IN), dtype=jnp.float32)

    # random sparse adjacency -> dense 0/1 mask (self loops so every row has an edge)
    adj_rand = jax.random.uniform(k_adj, (N, N))
    adj_mask = (adj_rand < 0.1).astype(jnp.float32)
    adj_mask = jnp.maximum(adj_mask, jnp.eye(N, dtype=jnp.float32))

    # deterministic "xavier_normal_(gain=relu)"-style init, in-script
    gain = jnp.sqrt(2.0)
    w_std = gain * jnp.sqrt(2.0 / (F_IN + F_OUT))
    a_std = gain * jnp.sqrt(2.0 / (1 + 2 * F_OUT))
    W = w_std * jax.random.normal(k_w, (HEADS, F_IN, F_OUT), dtype=jnp.float32)
    A = a_std * jax.random.normal(k_a, (HEADS, 2 * F_OUT), dtype=jnp.float32)

    out = graph_att_conv(x, adj_mask, W, A)
    out = jax.block_until_ready(out)

    ref = graph_att_conv_ref(x, adj_mask, W, A)
    assert out.shape == (N, OUT_FEATURES), out.shape
    max_err = float(jnp.max(jnp.abs(out - ref)))
    assert jnp.allclose(out, ref, atol=2e-4, rtol=2e-4), max_err

    print("KERNEL_OK")
</pallas_src>

<mosaic_0001>
module attributes {stable_mosaic.version = 11 : i64} {
  func.func @gat_project_kernel(%arg0: memref<128x32xf32, #tpu.memory_space<vmem>>, %arg1: memref<32x32xf32, #tpu.memory_space<vmem>>, %arg2: memref<32x8xf32, #tpu.memory_space<vmem>>, %arg3: memref<128x32xf32, #tpu.memory_space<vmem>>, %arg4: memref<128x4xf32, #tpu.memory_space<vmem>>, %arg5: memref<4x128xf32, #tpu.memory_space<vmem>>) attributes {dimension_semantics = [], scalar_prefetch = 0 : i64, scratch_operands = 0 : i64, tpu.core_type = #tpu.core_type<tc>} {
    %c0 = arith.constant 0 : index
    %c0_0 = arith.constant 0 : index
    %0 = vector.load %arg0[%c0, %c0_0] : memref<128x32xf32, #tpu.memory_space<vmem>>, vector<128x32xf32>
    %c0_1 = arith.constant 0 : index
    %c0_2 = arith.constant 0 : index
    %1 = vector.load %arg1[%c0_1, %c0_2] : memref<32x32xf32, #tpu.memory_space<vmem>>, vector<32x32xf32>
    %cst = arith.constant dense<0.000000e+00> : vector<128x32xf32>
    %2 = tpu.matmul %0, %1, %cst {dimension_numbers = #tpu.dot_dimension_numbers<[1], [0], [0], [1], [0, 0, 1, 1], [], []>} : vector<128x32xf32>, vector<32x32xf32>, vector<128x32xf32> -> vector<128x32xf32>
    %c0_3 = arith.constant 0 : index
    %c0_4 = arith.constant 0 : index
    %3 = vector.load %arg2[%c0_3, %c0_4] : memref<32x8xf32, #tpu.memory_space<vmem>>, vector<32x8xf32>
    %cst_5 = arith.constant dense<0.000000e+00> : vector<128x8xf32>
    %4 = tpu.matmul %2, %3, %cst_5 {dimension_numbers = #tpu.dot_dimension_numbers<[1], [0], [0], [1], [0, 0, 1, 1], [], []>} : vector<128x32xf32>, vector<32x8xf32>, vector<128x8xf32> -> vector<128x8xf32>
    %c0_6 = arith.constant 0 : index
    %c0_7 = arith.constant 0 : index
    %5 = vector.load %arg3[%c0_6, %c0_7] : memref<128x32xf32, #tpu.memory_space<vmem>>, vector<128x32xf32>
    tpu.vector_store %arg3[%c0_6, %c0_7], %2 {strides = array<i32>} : memref<128x32xf32, #tpu.memory_space<vmem>>, vector<128x32xf32>,
    %6 = vector.extract_strided_slice %4 {offsets = [0, 0], sizes = [128, 4], strides = [1, 1]} : vector<128x8xf32> to vector<128x4xf32>
    %c0_8 = arith.constant 0 : index
    %c0_9 = arith.constant 0 : index
    %7 = vector.load %arg4[%c0_8, %c0_9] : memref<128x4xf32, #tpu.memory_space<vmem>>, vector<128x4xf32>
    tpu.vector_store %arg4[%c0_8, %c0_9], %6 {strides = array<i32>} : memref<128x4xf32, #tpu.memory_space<vmem>>, vector<128x4xf32>,
    %8 = vector.extract_strided_slice %4 {offsets = [0, 4], sizes = [128, 4], strides = [1, 1]} : vector<128x8xf32> to vector<128x4xf32>
    %9 = tpu.transpose %8, [1, 0] : vector<128x4xf32> -> vector<4x128xf32>
    %c0_10 = arith.constant 0 : index
    %c0_11 = arith.constant 0 : index
    %10 = vector.load %arg5[%c0_10, %c0_11] : memref<4x128xf32, #tpu.memory_space<vmem>>, vector<4x128xf32>
    tpu.vector_store %arg5[%c0_10, %c0_11], %9 {strides = array<i32>} : memref<4x128xf32, #tpu.memory_space<vmem>>, vector<4x128xf32>,
    return
  }
}

module attributes {stable_mosaic.version = 11 : i64} {
  func.func @gat_attention_kernel(%arg0: i32, %arg1: memref<64x128xi8, #tpu.memory_space<vmem>>, %arg2: memref<64x4xf32, #tpu.memory_space<vmem>>, %arg3: memref<128x32xf32, #tpu.memory_space<vmem>>, %arg4: memref<4x128xf32, #tpu.memory_space<vmem>>, %arg5: memref<4x32xf32, #tpu.memory_space<vmem>>, %arg6: memref<64x32xf32, #tpu.memory_space<vmem>>) attributes {dimension_semantics = [#tpu.dimension_semantics<parallel>], iteration_bounds = array<i64: 2>, scalar_prefetch = 0 : i64, scratch_operands = 0 : i64, tpu.core_type = #tpu.core_type<tc>, window_params = [{transform_indices = @transform_0, window_bounds = array<i64: 64, 128>}, {transform_indices = @transform_1, window_bounds = array<i64: 64, 4>}, {pipeline_mode = #tpu.pipeline_mode<synchronous>, transform_indices = @transform_2, window_bounds = array<i64: 128, 32>}, {pipeline_mode = #tpu.pipeline_mode<synchronous>, transform_indices = @transform_3, window_bounds = array<i64: 4, 128>}, {pipeline_mode = #tpu.pipeline_mode<synchronous>, transform_indices = @transform_4, window_bounds = array<i64: 4, 32>}, {transform_indices = @transform_5, window_bounds = array<i64: 64, 32>}]} {
    %c0 = arith.constant 0 : index
    %c0_0 = arith.constant 0 : index
    %0 = vector.load %arg1[%c0, %c0_0] : memref<64x128xi8, #tpu.memory_space<vmem>>, vector<64x128xi8>
    %1 = arith.sitofp %0 : vector<64x128xi8> to vector<64x128xf32>
    %cst = arith.constant 1.000000e+00 : f32
    %2 = vector.broadcast %cst : f32 to vector<64x128xf32>
    %3 = arith.subf %1, %2 : vector<64x128xf32>
    %cst_1 = arith.constant 1.000000e+09 : f32
    %4 = vector.broadcast %cst_1 : f32 to vector<64x128xf32>
    %5 = arith.mulf %3, %4 : vector<64x128xf32>
    %cst_2 = arith.constant dense<0xFF800000> : vector<64xf32>
    %6 = vector.multi_reduction <maximumf>, %1, %cst_2 [1] : vector<64x128xf32> to vector<64xf32>
    %7 = vector.shape_cast %6 : vector<64xf32> to vector<64x1xf32>
    %c0_3 = arith.constant 0 : index
    %c0_4 = arith.constant 0 : index
    %8 = vector.load %arg2[%c0_3, %c0_4] : memref<64x4xf32, #tpu.memory_space<vmem>>, vector<64x4xf32>
    %c0_5 = arith.constant 0 : index
    %c0_6 = arith.constant 0 : index
    %9 = vector.load %arg4[%c0_5, %c0_6] : memref<4x128xf32, #tpu.memory_space<vmem>>, vector<4x128xf32>
    %c0_7 = arith.constant 0 : index
    %c0_8 = arith.constant 0 : index
    %10 = vector.load %arg3[%c0_7, %c0_8] : memref<128x32xf32, #tpu.memory_space<vmem>>, vector<128x32xf32>
    %c0_9 = arith.constant 0 : index
    %c0_10 = arith.constant 0 : index
    %11 = vector.load %arg5[%c0_9, %c0_10] : memref<4x32xf32, #tpu.memory_space<vmem>>, vector<4x32xf32>
    %cst_11 = arith.constant 0.000000e+00 : f32
    %12 = vector.broadcast %cst_11 : f32 to vector<64x32xf32>
    %13 = vector.extract_strided_slice %8 {offsets = [0, 0], sizes = [64, 1], strides = [1, 1]} : vector<64x4xf32> to vector<64x1xf32>
    %14 = vector.extract_strided_slice %9 {offsets = [0, 0], sizes = [1, 128], strides = [1, 1]} : vector<4x128xf32> to vector<1x128xf32>
    %15 = vector.broadcast %13 : vector<64x1xf32> to vector<64x128xf32>
    %16 = vector.broadcast %14 : vector<1x128xf32> to vector<64x128xf32>
    %17 = arith.addf %15, %16 : vector<64x128xf32>
    %cst_12 = arith.constant 2.000000e-01 : f32
    %18 = vector.broadcast %cst_12 : f32 to vector<64x128xf32>
    %19 = arith.mulf %18, %17 : vector<64x128xf32>
    %20 = arith.maximumf %17, %19 : vector<64x128xf32>
    %21 = arith.addf %20, %5 : vector<64x128xf32>
    %cst_13 = arith.constant dense<0xFF800000> : vector<64xf32>
    %22 = vector.multi_reduction <maximumf>, %21, %cst_13 [1] : vector<64x128xf32> to vector<64xf32>
    %23 = vector.shape_cast %22 : vector<64xf32> to vector<64x1xf32>
    %24 = vector.broadcast %23 : vector<64x1xf32> to vector<64x128xf32>
    %25 = arith.subf %21, %24 : vector<64x128xf32>
    %26 = math.exp %25 : vector<64x128xf32>
    %cst_14 = arith.constant dense<0.000000e+00> : vector<64xf32>
    %27 = vector.multi_reduction <add>, %26, %cst_14 [1] : vector<64x128xf32> to vector<64xf32>
    %28 = vector.shape_cast %27 : vector<64xf32> to vector<64x1xf32>
    %cst_15 = arith.constant 1.000000e-16 : f32
    %29 = vector.broadcast %cst_15 : f32 to vector<64x1xf32>
    %30 = arith.addf %28, %29 : vector<64x1xf32>
    %31 = tpu.reciprocal %30 {approx = true} : vector<64x1xf32> -> vector<64x1xf32>
    %32 = arith.mulf %30, %31 : vector<64x1xf32>
    %cst_16 = arith.constant 2.000000e+00 : f32
    %33 = vector.broadcast %cst_16 : f32 to vector<64x1xf32>
    %34 = arith.subf %33, %32 : vector<64x1xf32>
    %35 = arith.mulf %31, %34 : vector<64x1xf32>
    %36 = vector.broadcast %35 : vector<64x1xf32> to vector<64x128xf32>
    %37 = arith.mulf %26, %36 : vector<64x128xf32>
    %cst_17 = arith.constant dense<0.000000e+00> : vector<64x32xf32>
    %38 = tpu.matmul %37, %10, %cst_17 {dimension_numbers = #tpu.dot_dimension_numbers<[1], [0], [0], [1], [0, 0, 1, 1], [], []>} : vector<64x128xf32>, vector<128x32xf32>, vector<64x32xf32> -> vector<64x32xf32>
    %39 = vector.extract_strided_slice %11 {offsets = [0, 0], sizes = [1, 32], strides = [1, 1]} : vector<4x32xf32> to vector<1x32xf32>
    %40 = vector.broadcast %39 : vector<1x32xf32> to vector<64x32xf32>
    %41 = arith.mulf %38, %40 : vector<64x32xf32>
    %42 = arith.addf %12, %41 : vector<64x32xf32>
    %43 = vector.extract_strided_slice %8 {offsets = [0, 1], sizes = [64, 1], strides = [1, 1]} : vector<64x4xf32> to vector<64x1xf32>
    %44 = vector.extract_strided_slice %9 {offsets = [1, 0], sizes = [1, 128], strides = [1, 1]} : vector<4x128xf32> to vector<1x128xf32>
    %45 = vector.broadcast %43 : vector<64x1xf32> to vector<64x128xf32>
    %46 = vector.broadcast %44 : vector<1x128xf32> to vector<64x128xf32>
    %47 = arith.addf %45, %46 : vector<64x128xf32>
    %cst_18 = arith.constant 2.000000e-01 : f32
    %48 = vector.broadcast %cst_18 : f32 to vector<64x128xf32>
    %49 = arith.mulf %48, %47 : vector<64x128xf32>
    %50 = arith.maximumf %47, %49 : vector<64x128xf32>
    %51 = arith.addf %50, %5 : vector<64x128xf32>
    %cst_19 = arith.constant dense<0xFF800000> : vector<64xf32>
    %52 = vector.multi_reduction <maximumf>, %51, %cst_19 [1] : vector<64x128xf32> to vector<64xf32>
    %53 = vector.shape_cast %52 : vector<64xf32> to vector<64x1xf32>
    %54 = vector.broadcast %53 : vector<64x1xf32> to vector<64x128xf32>
    %55 = arith.subf %51, %54 : vector<64x128xf32>
    %56 = math.exp %55 : vector<64x128xf32>
    %cst_20 = arith.constant dense<0.000000e+00> : vector<64xf32>
    %57 = vector.multi_reduction <add>, %56, %cst_20 [1] : vector<64x128xf32> to vector<64xf32>
    %58 = vector.shape_cast %57 : vector<64xf32> to vector<64x1xf32>
    %cst_21 = arith.constant 1.000000e-16 : f32
    %59 = vector.broadcast %cst_21 : f32 to vector<64x1xf32>
    %60 = arith.addf %58, %59 : vector<64x1xf32>
    %61 = tpu.reciprocal %60 {approx = true} : vector<64x1xf32> -> vector<64x1xf32>
    %62 = arith.mulf %60, %61 : vector<64x1xf32>
    %cst_22 = arith.constant 2.000000e+00 : f32
    %63 = vector.broadcast %cst_22 : f32 to vector<64x1xf32>
    %64 = arith.subf %63, %62 : vector<64x1xf32>
    %65 = arith.mulf %61, %64 : vector<64x1xf32>
    %66 = vector.broadcast %65 : vector<64x1xf32> to vector<64x128xf32>
    %67 = arith.mulf %56, %66 : vector<64x128xf32>
    %cst_23 = arith.constant dense<0.000000e+00> : vector<64x32xf32>
    %68 = tpu.matmul %67, %10, %cst_23 {dimension_numbers = #tpu.dot_dimension_numbers<[1], [0], [0], [1], [0, 0, 1, 1], [], []>} : vector<64x128xf32>, vector<128x32xf32>, vector<64x32xf32> -> vector<64x32xf32>
    %69 = vector.extract_strided_slice %11 {offsets = [1, 0], sizes = [1, 32], strides = [1, 1]} : vector<4x32xf32> to vector<1x32xf32>
    %70 = vector.broadcast %69 : vector<1x32xf32> to vector<64x32xf32>
    %71 = arith.mulf %68, %70 : vector<64x32xf32>
    %72 = arith.addf %42, %71 : vector<64x32xf32>
    %73 = vector.extract_strided_slice %8 {offsets = [0, 2], sizes = [64, 1], strides = [1, 1]} : vector<64x4xf32> to vector<64x1xf32>
    %74 = vector.extract_strided_slice %9 {offsets = [2, 0], sizes = [1, 128], strides = [1, 1]} : vector<4x128xf32> to vector<1x128xf32>
    %75 = vector.broadcast %73 : vector<64x1xf32> to vector<64x128xf32>
    %76 = vector.broadcast %74 : vector<1x128xf32> to vector<64x128xf32>
    %77 = arith.addf %75, %76 : vector<64x128xf32>
    %cst_24 = arith.constant 2.000000e-01 : f32
    %78 = vector.broadcast %cst_24 : f32 to vector<64x128xf32>
    %79 = arith.mulf %78, %77 : vector<64x128xf32>
    %80 = arith.maximumf %77, %79 : vector<64x128xf32>
    %81 = arith.addf %80, %5 : vector<64x128xf32>
    %cst_25 = arith.constant dense<0xFF800000> : vector<64xf32>
    %82 = vector.multi_reduction <maximumf>, %81, %cst_25 [1] : vector<64x128xf32> to vector<64xf32>
    %83 = vector.shape_cast %82 : vector<64xf32> to vector<64x1xf32>
    %84 = vector.broadcast %83 : vector<64x1xf32> to vector<64x128xf32>
    %85 = arith.subf %81, %84 : vector<64x128xf32>
    %86 = math.exp %85 : vector<64x128xf32>
    %cst_26 = arith.constant dense<0.000000e+00> : vector<64xf32>
    %87 = vector.multi_reduction <add>, %86, %cst_26 [1] : vector<64x128xf32> to vector<64xf32>
    %88 = vector.shape_cast %87 : vector<64xf32> to vector<64x1xf32>
    %cst_27 = arith.constant 1.000000e-16 : f32
    %89 = vector.broadcast %cst_27 : f32 to vector<64x1xf32>
    %90 = arith.addf %88, %89 : vector<64x1xf32>
    %91 = tpu.reciprocal %90 {approx = true} : vector<64x1xf32> -> vector<64x1xf32>
    %92 = arith.mulf %90, %91 : vector<64x1xf32>
    %cst_28 = arith.constant 2.000000e+00 : f32
    %93 = vector.broadcast %cst_28 : f32 to vector<64x1xf32>
    %94 = arith.subf %93, %92 : vector<64x1xf32>
    %95 = arith.mulf %91, %94 : vector<64x1xf32>
    %96 = vector.broadcast %95 : vector<64x1xf32> to vector<64x128xf32>
    %97 = arith.mulf %86, %96 : vector<64x128xf32>
    %cst_29 = arith.constant dense<0.000000e+00> : vector<64x32xf32>
    %98 = tpu.matmul %97, %10, %cst_29 {dimension_numbers = #tpu.dot_dimension_numbers<[1], [0], [0], [1], [0, 0, 1, 1], [], []>} : vector<64x128xf32>, vector<128x32xf32>, vector<64x32xf32> -> vector<64x32xf32>
    %99 = vector.extract_strided_slice %11 {offsets = [2, 0], sizes = [1, 32], strides = [1, 1]} : vector<4x32xf32> to vector<1x32xf32>
    %100 = vector.broadcast %99 : vector<1x32xf32> to vector<64x32xf32>
    %101 = arith.mulf %98, %100 : vector<64x32xf32>
    %102 = arith.addf %72, %101 : vector<64x32xf32>
    %103 = vector.extract_strided_slice %8 {offsets = [0, 3], sizes = [64, 1], strides = [1, 1]} : vector<64x4xf32> to vector<64x1xf32>
    %104 = vector.extract_strided_slice %9 {offsets = [3, 0], sizes = [1, 128], strides = [1, 1]} : vector<4x128xf32> to vector<1x128xf32>
    %105 = vector.broadcast %103 : vector<64x1xf32> to vector<64x128xf32>
    %106 = vector.broadcast %104 : vector<1x128xf32> to vector<64x128xf32>
    %107 = arith.addf %105, %106 : vector<64x128xf32>
    %cst_30 = arith.constant 2.000000e-01 : f32
    %108 = vector.broadcast %cst_30 : f32 to vector<64x128xf32>
    %109 = arith.mulf %108, %107 : vector<64x128xf32>
    %110 = arith.maximumf %107, %109 : vector<64x128xf32>
    %111 = arith.addf %110, %5 : vector<64x128xf32>
    %cst_31 = arith.constant dense<0xFF800000> : vector<64xf32>
    %112 = vector.multi_reduction <maximumf>, %111, %cst_31 [1] : vector<64x128xf32> to vector<64xf32>
    %113 = vector.shape_cast %112 : vector<64xf32> to vector<64x1xf32>
    %114 = vector.broadcast %113 : vector<64x1xf32> to vector<64x128xf32>
    %115 = arith.subf %111, %114 : vector<64x128xf32>
    %116 = math.exp %115 : vector<64x128xf32>
    %cst_32 = arith.constant dense<0.000000e+00> : vector<64xf32>
    %117 = vector.multi_reduction <add>, %116, %cst_32 [1] : vector<64x128xf32> to vector<64xf32>
    %118 = vector.shape_cast %117 : vector<64xf32> to vector<64x1xf32>
    %cst_33 = arith.constant 1.000000e-16 : f32
    %119 = vector.broadcast %cst_33 : f32 to vector<64x1xf32>
    %120 = arith.addf %118, %119 : vector<64x1xf32>
    %121 = tpu.reciprocal %120 {approx = true} : vector<64x1xf32> -> vector<64x1xf32>
    %122 = arith.mulf %120, %121 : vector<64x1xf32>
    %cst_34 = arith.constant 2.000000e+00 : f32
    %123 = vector.broadcast %cst_34 : f32 to vector<64x1xf32>
    %124 = arith.subf %123, %122 : vector<64x1xf32>
    %125 = arith.mulf %121, %124 : vector<64x1xf32>
    %126 = vector.broadcast %125 : vector<64x1xf32> to vector<64x128xf32>
    %127 = arith.mulf %116, %126 : vector<64x128xf32>
    %cst_35 = arith.constant dense<0.000000e+00> : vector<64x32xf32>
    %128 = tpu.matmul %127, %10, %cst_35 {dimension_numbers = #tpu.dot_dimension_numbers<[1], [0], [0], [1], [0, 0, 1, 1], [], []>} : vector<64x128xf32>, vector<128x32xf32>, vector<64x32xf32> -> vector<64x32xf32>
    %129 = vector.extract_strided_slice %11 {offsets = [3, 0], sizes = [1, 32], strides = [1, 1]} : vector<4x32xf32> to vector<1x32xf32>
    %130 = vector.broadcast %129 : vector<1x32xf32> to vector<64x32xf32>
    %131 = arith.mulf %128, %130 : vector<64x32xf32>
    %132 = arith.addf %102, %131 : vector<64x32xf32>
    %133 = vector.broadcast %7 : vector<64x1xf32> to vector<64x32xf32>
    %134 = arith.mulf %132, %133 : vector<64x32xf32>
    %c0_36 = arith.constant 0 : index
    %c0_37 = arith.constant 0 : index
    %135 = vector.load %arg6[%c0_36, %c0_37] : memref<64x32xf32, #tpu.memory_space<vmem>>, vector<64x32xf32>
    tpu.vector_store %arg6[%c0_36, %c0_37], %134 {strides = array<i32>} : memref<64x32xf32, #tpu.memory_space<vmem>>, vector<64x32xf32>,
    return
  }
  func.func @transform_0(%arg0: i32) -> (i32, i32) {
    %c0_i32 = arith.constant 0 : i32
    %c0_i32_0 = arith.constant 0 : i32
    return %arg0, %c0_i32 : i32, i32
  }
  func.func @transform_1(%arg0: i32) -> (i32, i32) {
    %c0_i32 = arith.constant 0 : i32
    %c0_i32_0 = arith.constant 0 : i32
    return %arg0, %c0_i32 : i32, i32
  }
  func.func @transform_2(%arg0: i32) -> (i32, i32) {
    %c0_i32 = arith.constant 0 : i32
    %c0_i32_0 = arith.constant 0 : i32
    %c0_i32_1 = arith.constant 0 : i32
    return %c0_i32, %c0_i32_0 : i32, i32
  }
  func.func @transform_3(%arg0: i32) -> (i32, i32) {
    %c0_i32 = arith.constant 0 : i32
    %c0_i32_0 = arith.constant 0 : i32
    %c0_i32_1 = arith.constant 0 : i32
    return %c0_i32, %c0_i32_0 : i32, i32
  }
  func.func @transform_4(%arg0: i32) -> (i32, i32) {
    %c0_i32 = arith.constant 0 : i32
    %c0_i32_0 = arith.constant 0 : i32
    %c0_i32_1 = arith.constant 0 : i32
    return %c0_i32, %c0_i32_0 : i32, i32
  }
  func.func @transform_5(%arg0: i32) -> (i32, i32) {
    %c0_i32 = arith.constant 0 : i32
    %c0_i32_0 = arith.constant 0 : i32
    return %arg0, %c0_i32 : i32, i32
  }
}

</mosaic_0001>

<bundles_post_ra>
// kernel: graph_att_conv.2
= control target key start
LH: loop header
LB: loop body
LE: loop exit
PB: predicated region body
PF: predicated region fallthrough
CT: control target
= control target key end

     0   :  { %vm37_vm0 = vcmask 261120   ;;  %vm284_vm1 = vcmask 31744   ;;  %s451_s18 = smov 124   ;;  %s733_s1 = inlined_call_operand.vmem [shape: f32[32,32], index: 1, kind: input, shape index: {}]   ;;  %s734_s0 = inlined_call_operand.vmem [shape: f32[128,32], index: 0, kind: input, shape index: {}]   ;;  %s735_s2 = inlined_call_operand.vmem [shape: f32[32,8], index: 2, kind: input, shape index: {}]   ;;  %s736_s3 = inlined_call_operand.vmem [shape: f32[128,32], index: 3, kind: output, shape index: {0}]   ;;  %s737_s4 = inlined_call_operand.vmem [shape: f32[128,4], index: 4, kind: output, shape index: {1}]   ;;  %s738_s5 = inlined_call_operand.vmem [shape: f32[4,128], index: 5, kind: output, shape index: {2}]  }
   0x1   :  { %v36_v0 = vld [vmem:[%s733_s1 + $0x18] sm:$0xff]  ;;  %v35_v1 = vld [vmem:[%s733_s1 + $0x10] sm:$0xff]  ;;  %v34_v2 = vld [vmem:[%s733_s1 + $0x8] sm:$0xff] }
   0x2   :  { %98 = vmatpush.msra.mxu0 %v36_v0  ;;  %442 = vmatpush.msra.mxu2 %v36_v0  ;;  %v33_v3 = vld [vmem:[%s733_s1] sm:$0xff]  ;;  %v18_v6 = vld [vmem:[%s734_s0 + $0x8] sm:$0xff]  ;;  %v19_v8 = vld [vmem:[%s734_s0 + $0x10] sm:$0xff] }
   0x3   :  { %v17_v4 = vld [vmem:[%s734_s0] sm:$0xff]  ;;  %v26_v7 = vld [vmem:[%s734_s0 + $0x48] sm:$0xff]  ;;  %v27_v9 = vld [vmem:[%s734_s0 + $0x50] sm:$0xff] }
   0x4   :  { %99 = vmatpush.msra.mxu0 %v35_v1  ;;  %443 = vmatpush.msra.mxu2 %v35_v1  ;;  %v25_v5 = vld [vmem:[%s734_s0 + $0x40] sm:$0xff]  ;;  %v20_v10 = vld [vmem:[%s734_s0 + $0x18] sm:$0xff]  ;;  %v153_v13 = vld [vmem:[%s735_s2 + $0x10] sm:$0xff] }
   0x5   :  { %v28_v11 = vld [vmem:[%s734_s0 + $0x58] sm:$0xff]  ;;  %v152_v14 = vld [vmem:[%s735_s2 + $0x8] sm:$0xff]  ;;  %v21_v15 = vld [vmem:[%s734_s0 + $0x20] sm:$0xff] }
   0x6   :  { %100 = vmatpush.msra.mxu0 %v34_v2  ;;  %444 = vmatpush.msra.mxu2 %v34_v2  ;;  %v154_v12 = vld [vmem:[%s735_s2 + $0x18] sm:$0xff]  ;;  %v29_v16 = vld [vmem:[%s734_s0 + $0x60] sm:$0xff]  ;;  %v22_v17 = vld [vmem:[%s734_s0 + $0x28] sm:$0xff] }
   0x7   :  { %215 = vmatpush.msra.mxu1 %v154_v12  ;;  %446 = vmatpush.msra.mxu3 %v154_v12  ;;  %v30_v18 = vld [vmem:[%s734_s0 + $0x68] sm:$0xff]  ;;  %v23_v19 = vld [vmem:[%s734_s0 + $0x30] sm:$0xff]  ;;  %v24_v21 = vld [vmem:[%s734_s0 + $0x38] sm:$0xff] }
   0x8   :  { %101 = vmatpush.msra.mxu0 %v33_v3  ;;  %445 = vmatpush.msra.mxu2 %v33_v3  ;;  %v31_v20 = vld [vmem:[%s734_s0 + $0x70] sm:$0xff]  ;;  %v32_v22 = vld [vmem:[%s734_s0 + $0x78] sm:$0xff]  ;;  %v151_v23 = vld [vmem:[%s735_s2] sm:$0xff] }
   0x9   :  { %410 = vmatmul.msk.f32.vlgmr.msra.gmra.mxu0 %vm37_vm0, %v17_v4  ;;  %418 = vmatmul.msk.f32.vlgmr.msra.gmra.mxu2 %vm37_vm0, %v25_v5 }
   0xa   :  { %216 = vmatpush.msra.mxu1 %v153_v13  ;;  %447 = vmatpush.msra.mxu3 %v153_v13 }
   0xc   :  { %217 = vmatpush.msra.mxu1 %v152_v14  ;;  %448 = vmatpush.msra.mxu3 %v152_v14 }
   0xe   :  { %218 = vmatpush.msra.mxu1 %v151_v23  ;;  %449 = vmatpush.msra.mxu3 %v151_v23 }
  0x11   :  { %411 = vmatmul.msk.f32.gmra.mxu0 %vm37_vm0, %v18_v6  ;;  %419 = vmatmul.msk.f32.gmra.mxu2 %vm37_vm0, %v26_v7 }
  0x19   :  { %412 = vmatmul.msk.f32.gmra.mxu0 %vm37_vm0, %v19_v8  ;;  %420 = vmatmul.msk.f32.gmra.mxu2 %vm37_vm0, %v27_v9 }
  0x21   :  { %413 = vmatmul.msk.f32.gmra.mxu0 %vm37_vm0, %v20_v10  ;;  %421 = vmatmul.msk.f32.gmra.mxu2 %vm37_vm0, %v28_v11 }
  0x29   :  { %414 = vmatmul.msk.f32.gmra.mxu0 %vm37_vm0, %v21_v15  ;;  %422 = vmatmul.msk.f32.gmra.mxu2 %vm37_vm0, %v29_v16 }
  0x31   :  { %415 = vmatmul.msk.f32.gmra.mxu0 %vm37_vm0, %v22_v17  ;;  %423 = vmatmul.msk.f32.gmra.mxu2 %vm37_vm0, %v30_v18 }
  0x39   :  { %416 = vmatmul.msk.f32.gmra.mxu0 %vm37_vm0, %v23_v19  ;;  %424 = vmatmul.msk.f32.gmra.mxu2 %vm37_vm0, %v31_v20 }
  0x41   :  { %417 = vmatmul.msk.f32.gmra.mxu0 %vm37_vm0, %v24_v21  ;;  %425 = vmatmul.msk.f32.gmra.mxu2 %vm37_vm0, %v32_v22 }
  0x86   :  { %v103_v24 = vpop.f32.mrf.mxu0 }
  0x87   :  { %268 = vst.msk [vmem:[%s736_s3] sm:$0xff] %vm37_vm0, %v103_v24  ;;  %426 = vmatmul.msk.f32.vlgmr.msra.gmra.mxu1 %vm37_vm0, %v103_v24 }
  0x8c   :  { %v127_v25 = vpop.f32.mrf.mxu2 }
  0x8d   :  { %276 = vst.msk [vmem:[%s736_s3 + $0x40] sm:$0xff] %vm37_vm0, %v127_v25  ;;  %434 = vmatmul.msk.f32.vlgmr.msra.gmra.mxu3 %vm37_vm0, %v127_v25 }
  0x8e   :  { %v106_v26 = vpop.f32.mrf.mxu0 }
  0x8f   :  { %269 = vst.msk [vmem:[%s736_s3 + $0x8] sm:$0xff] %vm37_vm0, %v106_v26  ;;  %427 = vmatmul.msk.f32.gmra.mxu1 %vm37_vm0, %v106_v26 }
  0x94   :  { %v130_v27 = vpop.f32.mrf.mxu2 }
  0x95   :  { %277 = vst.msk [vmem:[%s736_s3 + $0x48] sm:$0xff] %vm37_vm0, %v130_v27  ;;  %435 = vmatmul.msk.f32.gmra.mxu3 %vm37_vm0, %v130_v27 }
  0x96   :  { %v109_v28 = vpop.f32.mrf.mxu0 }
  0x97   :  { %270 = vst.msk [vmem:[%s736_s3 + $0x10] sm:$0xff] %vm37_vm0, %v109_v28  ;;  %428 = vmatmul.msk.f32.gmra.mxu1 %vm37_vm0, %v109_v28 }
  0x9c   :  { %v133_v29 = vpop.f32.mrf.mxu2 }
  0x9d   :  { %278 = vst.msk [vmem:[%s736_s3 + $0x50] sm:$0xff] %vm37_vm0, %v133_v29  ;;  %436 = vmatmul.msk.f32.gmra.mxu3 %vm37_vm0, %v133_v29 }
  0x9e   :  { %v112_v30 = vpop.f32.mrf.mxu0 }
  0x9f   :  { %271 = vst.msk [vmem:[%s736_s3 + $0x18] sm:$0xff] %vm37_vm0, %v112_v30  ;;  %429 = vmatmul.msk.f32.gmra.mxu1 %vm37_vm0, %v112_v30 }
  0xa4   :  { %v136_v31 = vpop.f32.mrf.mxu2 }
  0xa5   :  { %279 = vst.msk [vmem:[%s736_s3 + $0x58] sm:$0xff] %vm37_vm0, %v136_v31  ;;  %437 = vmatmul.msk.f32.gmra.mxu3 %vm37_vm0, %v136_v31 }
  0xa6   :  { %v115_v32 = vpop.f32.mrf.mxu0 }
  0xa7   :  { %272 = vst.msk [vmem:[%s736_s3 + $0x20] sm:$0xff] %vm37_vm0, %v115_v32  ;;  %430 = vmatmul.msk.f32.gmra.mxu1 %vm37_vm0, %v115_v32 }
  0xac   :  { %v139_v33 = vpop.f32.mrf.mxu2 }
  0xad   :  { %280 = vst.msk [vmem:[%s736_s3 + $0x60] sm:$0xff] %vm37_vm0, %v139_v33  ;;  %438 = vmatmul.msk.f32.gmra.mxu3 %vm37_vm0, %v139_v33 }
  0xae   :  { %v118_v34 = vpop.f32.mrf.mxu0 }
  0xaf   :  { %273 = vst.msk [vmem:[%s736_s3 + $0x28] sm:$0xff] %vm37_vm0, %v118_v34  ;;  %431 = vmatmul.msk.f32.gmra.mxu1 %vm37_vm0, %v118_v34 }
  0xb4   :  { %v142_v35 = vpop.f32.mrf.mxu2 }
  0xb5   :  { %281 = vst.msk [vmem:[%s736_s3 + $0x68] sm:$0xff] %vm37_vm0, %v142_v35  ;;  %439 = vmatmul.msk.f32.gmra.mxu3 %vm37_vm0, %v142_v35 }
  0xb6   :  { %v121_v36 = vpop.f32.mrf.mxu0 }
  0xb7   :  { %274 = vst.msk [vmem:[%s736_s3 + $0x30] sm:$0xff] %vm37_vm0, %v121_v36  ;;  %432 = vmatmul.msk.f32.gmra.mxu1 %vm37_vm0, %v121_v36 }
  0xbc   :  { %v145_v37 = vpop.f32.mrf.mxu2 }
  0xbd   :  { %282 = vst.msk [vmem:[%s736_s3 + $0x70] sm:$0xff] %vm37_vm0, %v145_v37  ;;  %440 = vmatmul.msk.f32.gmra.mxu3 %vm37_vm0, %v145_v37 }
  0xbe   :  { %v124_v38 = vpop.f32.mrf.mxu0 }
  0xbf   :  { %275 = vst.msk [vmem:[%s736_s3 + $0x38] sm:$0xff] %vm37_vm0, %v124_v38  ;;  %433 = vmatmul.msk.f32.gmra.mxu1 %vm37_vm0, %v124_v38 }
  0xc4   :  { %v148_v39 = vpop.f32.mrf.mxu2 }
  0xc5   :  { %283 = vst.msk [vmem:[%s736_s3 + $0x78] sm:$0xff] %vm37_vm0, %v148_v39  ;;  %441 = vmatmul.msk.f32.gmra.mxu3 %vm37_vm0, %v148_v39 }
 0x104   :  { %v220_v40 = vpop.f32.mrf.mxu1 }
 0x105   :  { %285 = vst.msk [vmem:[%s737_s4] sm:$0xff] %vm284_vm1, %v220_v40  ;;  %317 = vrot.lane.b32.xlu0 %v220_v40, %s451_s18 }
 0x10c   :  { %v223_v41 = vpop.f32.mrf.mxu1 }
 0x10d   :  { %286 = vst.msk [vmem:[%s737_s4 + $0x8] sm:$0xff] %vm284_vm1, %v223_v41  ;;  %319 = vrot.lane.b32.xlu0 %v223_v41, %s451_s18 }
 0x110   :  { %v244_v42 = vpop.f32.mrf.mxu3 }
 0x111   :  { %293 = vst.msk [vmem:[%s737_s4 + $0x40] sm:$0xff] %vm284_vm1, %v244_v42 }
 0x114   :  { %v226_v43 = vpop.f32.mrf.mxu1 }
 0x115   :  { %287 = vst.msk [vmem:[%s737_s4 + $0x10] sm:$0xff] %vm284_vm1, %v226_v43  ;;  %321 = vrot.lane.b32.xlu1 %v226_v43, %s451_s18 }
 0x118   :  { %v247_v44 = vpop.f32.mrf.mxu3 }
 0x119   :  { %294 = vst.msk [vmem:[%s737_s4 + $0x48] sm:$0xff] %vm284_vm1, %v247_v44 }
 0x11c   :  { %v229_v45 = vpop.f32.mrf.mxu1 }
 0x11d   :  { %288 = vst.msk [vmem:[%s737_s4 + $0x18] sm:$0xff] %vm284_vm1, %v229_v45  ;;  %323 = vrot.lane.b32.xlu1 %v229_v45, %s451_s18 }
 0x120   :  { %v250_v46 = vpop.f32.mrf.mxu3 }
 0x121   :  { %295 = vst.msk [vmem:[%s737_s4 + $0x50] sm:$0xff] %vm284_vm1, %v250_v46 }
 0x124   :  { %v232_v47 = vpop.f32.mrf.mxu1 }
 0x125   :  { %289 = vst.msk [vmem:[%s737_s4 + $0x20] sm:$0xff] %vm284_vm1, %v232_v47  ;;  %337 = vrot.lane.b32.xlu1 %v250_v46, %s451_s18  ;;  %325 = vrot.lane.b32.xlu2 %v232_v47, %s451_s18 }
 0x128   :  { %v253_v48 = vpop.f32.mrf.mxu3 }
 0x129   :  { %296 = vst.msk [vmem:[%s737_s4 + $0x58] sm:$0xff] %vm284_vm1, %v253_v48 }
 0x12c   :  { %v235_v49 = vpop.f32.mrf.mxu1 }
 0x12d   :  { %290 = vst.msk [vmem:[%s737_s4 + $0x28] sm:$0xff] %vm284_vm1, %v235_v49  ;;  %327 = vrot.lane.b32.xlu2 %v235_v49, %s451_s18 }
 0x130   :  { %v256_v50 = vpop.f32.mrf.mxu3 }
 0x131   :  { %297 = vst.msk [vmem:[%s737_s4 + $0x60] sm:$0xff] %vm284_vm1, %v256_v50 }
 0x134   :  { %v238_v51 = vpop.f32.mrf.mxu1 }
 0x135   :  { %291 = vst.msk [vmem:[%s737_s4 + $0x30] sm:$0xff] %vm284_vm1, %v238_v51  ;;  %333 = vrot.lane.b32.xlu2 %v244_v42, %s451_s18  ;;  %329 = vrot.lane.b32.xlu0 %v238_v51, %s451_s18 }
 0x138   :  { %v259_v52 = vpop.f32.mrf.mxu3 }
 0x139   :  { %298 = vst.msk [vmem:[%s737_s4 + $0x68] sm:$0xff] %vm284_vm1, %v259_v52  ;;  %343 = vrot.lane.b32.xlu1 %v259_v52, %s451_s18 }
 0x13c   :  { %v241_v53 = vpop.f32.mrf.mxu1 }
 0x13d   :  { %339 = vrot.lane.b32.xlu2 %v253_v48, %s451_s18  ;;  %335 = vrot.lane.b32.xlu0 %v247_v44, %s451_s18  ;;  %292 = vst.msk [vmem:[%s737_s4 + $0x38] sm:$0xff] %vm284_vm1, %v241_v53 }
 0x140   :  { %v262_v54 = vpop.f32.mrf.mxu3 }
 0x141   :  { %331 = vrot.lane.b32.xlu1 %v241_v53, %s451_s18  ;;  %299 = vst.msk [vmem:[%s737_s4 + $0x70] sm:$0xff] %vm284_vm1, %v262_v54 }
 0x145   :  { %341 = vrot.lane.b32.xlu0 %v256_v50, %s451_s18  ;;  %345 = vrot.lane.b32.xlu2 %v262_v54, %s451_s18 }
 0x148   :  { %v265_v55 = vpop.f32.mrf.mxu3 }
 0x149   :  { %300 = vst.msk [vmem:[%s737_s4 + $0x78] sm:$0xff] %vm284_vm1, %v265_v55 }
 0x14d   :  { %347 = vrot.lane.b32.xlu0 %v265_v55, %s451_s18 }
 0x177   :  { %v318_v56 = vpop.permute.xlu0 %317 }
 0x178   :  { %365 = vxpose.xlu1.b32.start [1/16] (narrow) %v318_v56, 8 }
 0x17f   :  { %v320_v57 = vpop.permute.xlu0 %319  ;;  %v326_v60 = vpop.permute.xlu2 %325 }
 0x180   :  { %366 = vxpose.xlu1.b32.cont [2/16] (narrow) %v320_v57, 8 }
 0x187   :  { %v322_v58 = vpop.permute.xlu1 %321  ;;  %v328_v61 = vpop.permute.xlu2 %327 }
 0x188   :  { %367 = vxpose.xlu1.b32.cont [3/16] (narrow) %v322_v58, 8 }
 0x18f   :  { %v324_v59 = vpop.permute.xlu1 %323  ;;  %v334_v2 = vpop.permute.xlu2 %333 }
 0x190   :  { %368 = vxpose.xlu1.b32.cont [4/16] (narrow) %v324_v59, 8 }
 0x197   :  { %v338_v62 = vpop.permute.xlu1 %337  ;;  %v340_v4 = vpop.permute.xlu2 %339 }
 0x198   :  { %369 = vxpose.xlu1.b32.cont [5/16] (narrow) %v326_v60, 8 }
 0x19f   :  { %v346_v6 = vpop.permute.xlu2 %345 }
 0x1a0   :  { %370 = vxpose.xlu1.b32.cont [6/16] (narrow) %v328_v61, 8 }
 0x1a7   :  { %v330_v63 = vpop.permute.xlu0 %329 }
 0x1a8   :  { %371 = vxpose.xlu1.b32.cont [7/16] (narrow) %v330_v63, 8 }
 0x1ab   :  { %v344_v0 = vpop.permute.xlu1 %343 }
 0x1af   :  { %v336_v3 = vpop.permute.xlu0 %335 }
 0x1b3   :  { %v332_v1 = vpop.permute.xlu1 %331 }
 0x1b4   :  { %372 = vxpose.xlu1.b32.cont [8/16] (narrow) %v332_v1, 8 }
 0x1b7   :  { %v342_v5 = vpop.permute.xlu0 %341 }
 0x1bc   :  { %373 = vxpose.xlu1.b32.cont [9/16] (narrow) %v334_v2, 8 }
 0x1bf   :  { %v348_v7 = vpop.permute.xlu0 %347 }
 0x1c4   :  { %374 = vxpose.xlu1.b32.cont [10/16] (narrow) %v336_v3, 8 }
 0x1cc   :  { %375 = vxpose.xlu1.b32.cont [11/16] (narrow) %v338_v62, 8 }
 0x1d4   :  { %376 = vxpose.xlu1.b32.cont [12/16] (narrow) %v340_v4, 8 }
 0x1dc   :  { %377 = vxpose.xlu1.b32.cont [13/16] (narrow) %v342_v5, 8 }
 0x1e4   :  { %378 = vxpose.xlu1.b32.cont [14/16] (narrow) %v344_v0, 8 }
 0x1ec   :  { %379 = vxpose.xlu1.b32.cont [15/16] (narrow) %v346_v6, 8 }
 0x1f4   :  { %380 = vxpose.xlu1.b32.end [16/16] (narrow) %v348_v7, 8 }
 0x220   :  { %v381_v8 = vpop.trf.xlu1 }
 0x221   :  { %397 = vst [vmem:[%s738_s5] sm:$0xf] %v381_v8 }

// kernel: graph_att_conv.3
= control target key start
LH: loop header
LB: loop body
LE: loop exit
PB: predicated region body
PF: predicated region fallthrough
CT: control target
= control target key end

     0   :  { %s1548_s18 = smov 0   ;;  %s2172_s0 = inlined_call_operand.vmem [shape: s8[128,128], index: 0, kind: input, shape index: {}]   ;;  %s2173_s1 = inlined_call_operand.vmem [shape: f32[128,4], index: 1, kind: input, shape index: {}]   ;;  %s2174_s2 = inlined_call_operand.vmem [shape: f32[128,32], index: 2, kind: input, shape index: {}]   ;;  %s2175_s3 = inlined_call_operand.vmem [shape: f32[4,128], index: 3, kind: input, shape index: {}]   ;;  %s2176_s4 = inlined_call_operand.vmem [shape: f32[4,32], index: 4, kind: input, shape index: {}]   ;;  %s2177_s5 = inlined_call_operand.vmem [shape: f32[128,32], index: 5, kind: output, shape index: {}]  }
   0x1 LB: > { %s1327_s19 = sadd.s32 4294967295, %s1512_s18   ;;  %p1331_p0 = scmp.ge.s32.totalorder %s1512_s18, 1  ;;  %s1512_s18 = sphi %s1548_s18, %s15_s18  }
   0x2   : > { %p199_p1 = scmp.lt.s32.totalorder %s1512_s18, 3 }
   0x4   : > { %p200_p2 = pnand %p1331_p0, %p199_p1 }
   0x5   : > { %s1332_s20 = sshll.u32 (!%p200_p2), %s1327_s19, 1  ;;  %s1334_s25 = sshll.u32 (!%p200_p2), %s1327_s19, 3 }
   0x6   : > { %203 = sbr.rel (%p200_p2) target bundleno = 949 (0x3b5), region = 40  ;;  %p233_p3 = scmp.lt.s32.totalorder (!%p200_p2), %s1332_s20, 3 }
   0x7   : > { %p239_p4 = scmp.lt.s32.totalorder (!%p200_p2), %s1334_s25, 15 }
   0xb   : > { %v1514_v0 = vmov 0   ;;  %s2179_s20 = smov (!%p233_p3, %s1332_s20), 3  ;;  %s2181_s25 = smov (!%p239_p4, %s1334_s25), 15  ;;  %v1619_v30 = vld [vmem:[%s2175_s3] sm:$0xf]  ;;  %v1515_v48 = vmov 2  }
   0xc   : > { %1360 = vset.pattern.permute.xlu2 %v1514_v0  ;;  %1361 = vset.pattern.permute.xlu0 %v1514_v0  ;;  %s1333_s21 = sshll.u32 %s2179_s20, 3  ;;  %s1335_s26 = sshll.u32 %s2181_s25, 3  ;;  %v1624_v32 = vperm.slane %v1619_v30, 0  ;;  %vm1250_vm0 = vcmask 261120  }
   0xd   : > { %1362 = vset.pattern.permute.xlu1 %v1514_v0  ;;  %s236_s24 = scalar_lea.vmem %s2172_s0, %s1333_s21  ;;  %s242_s29 = scalar_lea.vmem %s2173_s1, %s1335_s26 }
   0xe   : > { %v251_v1 = vld [vmem:[%s236_s24 + $0x8] sm:$0xff]  ;;  %v250_v2 = vld [vmem:[%s236_s24] sm:$0xff]  ;;  %v1592_v21 = vld [vmem:[%s242_s29 + $0x18] sm:$0xff]  ;;  %s2115_s22 = scalar_lea.vmem %s2177_s5, %s1335_s26 }
   0xf   : > { %v256_v3 = vunpack.c.0.s8 %v251_v1  ;;  %v254_v4 = vunpack.c.2.s8 %v250_v2  ;;  %v252_v5 = vunpack.c.0.s8 %v250_v2  ;;  %v257_v9 = vunpack.c.1.s8 %v251_v1  ;;  %v1586_v19 = vld [vmem:[%s242_s29] sm:$0xff]  ;;  %v1589_v20 = vld [vmem:[%s242_s29 + $0x8] sm:$0xff]  ;;  %v1594_v22 = vld [vmem:[%s242_s29 + $0x10] sm:$0xff] }
  0x10   : > { %v255_v10 = vunpack.c.3.s8 %v250_v2  ;;  %v253_v11 = vunpack.c.1.s8 %v250_v2  ;;  %v259_v15 = vunpack.c.3.s8 %v251_v1  ;;  %v258_v16 = vunpack.c.2.s8 %v251_v1  ;;  %v1598_v23 = vld [vmem:[%s242_s29 + $0x20] sm:$0xff]  ;;  %v1600_v24 = vld [vmem:[%s242_s29 + $0x28] sm:$0xff]  ;;  %v1604_v25 = vld [vmem:[%s242_s29 + $0x30] sm:$0xff] }
  0x11   : > { %v264_v6 = vcvt.s32.f32 %v256_v3  ;;  %v1561_v7 = vcvt.s32.f32 %v254_v4  ;;  %v260_v8 = vcvt.s32.f32 %v252_v5  ;;  %v1564_v12 = vcvt.s32.f32 %v257_v9  ;;  %v1606_v26 = vld [vmem:[%s242_s29 + $0x38] sm:$0xff] }
  0x12   : > { %v1566_v13 = vcvt.s32.f32 %v255_v10  ;;  %v261_v14 = vcvt.s32.f32 %v253_v11  ;;  %v1570_v17 = vcvt.s32.f32 %v259_v15  ;;  %v1574_v18 = vcvt.s32.f32 %v258_v16 }
  0x13   : > { %292 = vmax.xlane.f32.xlu2 %v264_v6  ;;  %288 = vmax.xlane.f32.xlu1 %v1561_v7  ;;  %v1338_v33 = vadd.f32 -1.0, %v260_v8  ;;  %v1342_v44 = vadd.f32 -1.0, %v264_v6  ;;  %v1340_v55 = vadd.f32 -1.0, %v1561_v7  ;;  %v1343_v6 = vadd.f32 -1.0, %v1564_v12 }
  0x14   : > { %284 = vmax.xlane.f32.xlu0 %v260_v8  ;;  %v1339_v50 = vadd.f32 -1.0, %v261_v14  ;;  %v1341_v63 = vadd.f32 -1.0, %v1566_v13 }
  0x15   : > { %v1629_v37 = vmul.f32 1e+09, %v1338_v33  ;;  %v1643_v49 = vmul.f32 1e+09, %v1342_v44  ;;  %v1656_v0 = vmul.f32 1e+09, %v1340_v55 }
  0x16   : > { %v1647_v56 = vmul.f32 1e+09, %v1339_v50  ;;  %v1663_v7 = vmul.f32 1e+09, %v1341_v63  ;;  %v1672_v15 = vmul.f32 1e+09, %v1343_v6 }
  0x1b   : > { %294 = vmax.xlane.f32.xlu2 %v1564_v12  ;;  %290 = vmax.xlane.f32.xlu1 %v1566_v13 }
  0x1c   : > { %286 = vmax.xlane.f32.xlu0 %v261_v14  ;;  %v1344_v14 = vadd.f32 -1.0, %v1574_v18 }
  0x23   : > { %298 = vmax.xlane.f32.xlu1 %v1570_v17 }
  0x24   : > { %296 = vmax.xlane.f32.xlu0 %v1574_v18 }
  0x33   : > { %328 = vperm.xlu2 %1360, %v1586_v19  }
  0x38   : > { %333 = vperm.xlu0 %1361, %v1589_v20  }
  0x3b   : > { %343 = vperm.xlu2 %1360, %v1592_v21  }
  0x3c   : > { %338 = vperm.xlu1 %1362, %v1594_v22  }
  0x43   : > { %348 = vperm.xlu2 %1360, %v1598_v23  }
  0x44   : > { %353 = vperm.xlu1 %1362, %v1600_v24  }
  0x4b   : > { %358 = vperm.xlu2 %1360, %v1604_v25  }
  0x4c   : > { %363 = vperm.xlu1 %1362, %v1606_v26  }
  0x54   : > { %1363 = vset.pattern.permute.xlu1 %v1515_v48 }
  0x86   : > { %v1610_v27 = vpop.xlane.xlu2 %292  ;;  %v1621_v31 = vpop.xlane.xlu1 %288 }
  0x87   : > { %v1612_v28 = vpop.xlane.xlu0 %284 }
  0x8e   : > { %v1614_v29 = vpop.xlane.xlu2 %294  ;;  %v1631_v40 = vpop.xlane.xlu1 %290 }
  0x8f   : > { %v1626_v35 = vpop.xlane.xlu0 %286 }
  0x96   : > { %v329_v34 = vpop.permute.xlu2 %328  ;;  %v1639_v45 = vpop.xlane.xlu1 %298 }
  0x97   : > { %v367_v36 = vadd.f32 %v1624_v32, %v329_v34  ;;  %v1637_v43 = vpop.xlane.xlu0 %296  ;;  %v1516_v34 = vmov 1  }
  0x98   : > { %1365 = vset.pattern.permute.xlu0 %v1516_v34 }
  0x99   : > { %v375_v38 = vmul.f32 0.2, %v367_v36 }
  0x9b   : > { %v383_v39 = vmax.f32 %v367_v36, %v375_v38  ;;  %v1517_v38 = vmov 3  }
  0x9c   : > { %1364 = vset.pattern.permute.xlu2 %v1517_v38 }
  0x9d   : > { %v1634_v41 = vadd.f32 %v383_v39, %v1629_v37  ;;  %v1345_v39 = vadd.f32 -1.0, %v1570_v17 }
  0x9e   : > { %v344_v42 = vpop.permute.xlu2 %343 }
  0x9f   : > { %399 = vmax.xlane.f32.xlu0 %v1634_v41  ;;  %v370_v57 = vadd.f32 %v1624_v32, %v344_v42  ;;  %v1681_v42 = vmul.f32 1e+09, %v1344_v14  ;;  %v1688_v50 = vmul.f32 1e+09, %v1345_v39 }
  0xa1   : > { %v378_v1 = vmul.f32 0.2, %v370_v57 }
  0xa3   : > { %v386_v8 = vmax.f32 %v370_v57, %v378_v1 }
  0xa5   : > { %v1675_v12 = vadd.f32 %v386_v8, %v1663_v7 }
  0xa6   : > { %v349_v46 = vpop.permute.xlu2 %348 }
  0xa7   : > { %v371_v47 = vadd.f32 %v1624_v32, %v349_v46 }
  0xa9   : > { %v379_v51 = vmul.f32 0.2, %v371_v47 }
  0xaa   : > { %v334_v52 = vpop.permute.xlu0 %333 }
  0xab   : > { %v387_v53 = vmax.f32 %v371_v47, %v379_v51  ;;  %v368_v54 = vadd.f32 %v1624_v32, %v334_v52 }
  0xad   : > { %v376_v58 = vmul.f32 0.2, %v368_v54  ;;  %v1651_v59 = vadd.f32 %v387_v53, %v1643_v49 }
  0xae   : > { %v339_v60 = vpop.permute.xlu1 %338  ;;  %v359_v4 = vpop.permute.xlu2 %358 }
  0xaf   : > { %v384_v61 = vmax.f32 %v368_v54, %v376_v58  ;;  %v369_v62 = vadd.f32 %v1624_v32, %v339_v60  ;;  %407 = vmax.xlane.f32.xlu0 %v1651_v59  ;;  %v373_v9 = vadd.f32 %v1624_v32, %v359_v4  ;;  %v1727_v54 = vperm.slane %v1619_v30, 3 }
  0xb0   : > { %v1738_v4 = vperm.slane %v1619_v30, 2 }
  0xb1   : > { %v377_v2 = vmul.f32 0.2, %v369_v62  ;;  %v1659_v3 = vadd.f32 %v384_v61, %v1647_v56  ;;  %v381_v16 = vmul.f32 0.2, %v373_v9 }
  0xb3   : > { %v385_v5 = vmax.f32 %v369_v62, %v377_v2  ;;  %401 = vmax.xlane.f32.xlu2 %v1659_v3  ;;  %v389_v18 = vmax.f32 %v373_v9, %v381_v16 }
  0xb5   : > { %v1667_v10 = vadd.f32 %v385_v5, %v1656_v0  ;;  %v1691_v52 = vadd.f32 %v389_v18, %v1681_v42 }
  0xb6   : > { %v354_v11 = vpop.permute.xlu1 %353 }
  0xb7   : > { %v372_v13 = vadd.f32 %v1624_v32, %v354_v11  ;;  %403 = vmax.xlane.f32.xlu1 %v1667_v10 }
  0xb9   : > { %v380_v33 = vmul.f32 0.2, %v372_v13 }
  0xbb   : > { %v388_v36 = vmax.f32 %v372_v13, %v380_v33  ;;  %405 = vmax.xlane.f32.xlu2 %v1675_v12 }
  0xbd   : > { %v1684_v44 = vadd.f32 %v388_v36, %v1672_v15 }
  0xbe   : > { %v364_v46 = vpop.permute.xlu1 %363 }
  0xbf   : > { %v374_v47 = vadd.f32 %v1624_v32, %v364_v46  ;;  %409 = vmax.xlane.f32.xlu1 %v1684_v44 }
  0xc1   : > { %v382_v51 = vmul.f32 0.2, %v374_v47 }
  0xc3   : > { %v390_v53 = vmax.f32 %v374_v47, %v382_v51  ;;  %411 = vmax.xlane.f32.xlu2 %v1691_v52 }
  0xc5   : > { %v1695_v17 = vadd.f32 %v390_v53, %v1688_v50 }
  0xc7   : > { %413 = vmax.xlane.f32.xlu0 %v1695_v17 }
  0xd8   : > { %789 = vperm.xlu1 %1363, %v1586_v19  }
  0xdb   : > { %562 = vperm.xlu0 %1365, %v1586_v19   ;;  %1016 = vperm.xlu2 %1364, %v1586_v19  }
  0xe0   : > { %793 = vperm.xlu1 %1363, %v1589_v20  }
  0xe3   : > { %1020 = vperm.xlu2 %1364, %v1589_v20   ;;  %1370 = vset.pattern.permute.xlu0 %v1515_v48 }
  0xe4   : > { %801 = vperm.xlu0 %1370, %v1592_v21  }
  0xe8   : > { %1366 = vset.pattern.permute.xlu1 %v1516_v34 }
  0xe9   : > { %566 = vperm.xlu1 %1366, %v1589_v20  }
  0xeb   : > { %1367 = vset.pattern.permute.xlu2 %v1515_v48 }
  0xec   : > { %797 = vperm.xlu2 %1367, %v1594_v22   ;;  %813 = vperm.xlu0 %1370, %v1604_v25  }
  0xf1   : > { %1368 = vset.pattern.permute.xlu1 %v1517_v38 }
  0xf2   : > { %1024 = vperm.xlu1 %1368, %v1594_v22  }
  0xf4   : > { %1369 = vset.pattern.permute.xlu2 %v1516_v34  ;;  %1373 = vset.pattern.permute.xlu0 %v1517_v38 }
  0xf5   : > { %570 = vperm.xlu2 %1369, %v1594_v22  }
  0xfa   : > { %1028 = vperm.xlu1 %1368, %v1592_v21  }
  0xfd   : > { %574 = vperm.xlu2 %1369, %v1592_v21  }
 0x102   : > { %1372 = vset.pattern.permute.xlu1 %v1516_v34 }
 0x103   : > { %582 = vperm.xlu1 %1372, %v1600_v24  }
 0x105   : > { %1371 = vset.pattern.permute.xlu2 %v1517_v38 }
 0x106   : > { %1032 = vperm.xlu2 %1371, %v1598_v23  }
 0x10b   : > { %1375 = vset.pattern.permute.xlu1 %v1515_v48 }
 0x10e   : > { %1036 = vperm.xlu2 %1371, %v1600_v24  }
 0x112   : > { %v400_v22 = vpop.xlane.xlu0 %399 }
 0x113   : > { %v415_v60 = vsub.f32 %v1634_v41, %v400_v22  ;;  %v1742_v41 = vperm.slane %v1619_v30, 1 }
 0x115   : > { %v423_v63 = vmul.f32 1.442695, %v415_v60 }
 0x116   : > { %1374 = vset.pattern.permute.xlu2 %v1516_v34 }
 0x117   : > { %1378 = vpow2.f32 %v423_v63  ;;  %v321_v63 = vld [vmem:[%s2174_s2 + $0x60] sm:$0xff] }
 0x11d   : > { %v1746_v16 = vpop.eup %1378 }
 0x122   : > { %v408_v55 = vpop.xlane.xlu0 %407 }
 0x123   : > { %v419_v53 = vsub.f32 %v1651_v59, %v408_v55 }
 0x126   : > { %v402_v19 = vpop.xlane.xlu2 %401 }
 0x127   : > { %v416_v9 = vsub.f32 %v1659_v3, %v402_v19 }
 0x12a   : > { %v404_v21 = vpop.xlane.xlu1 %403 }
 0x12b   : > { %v417_v36 = vsub.f32 %v1667_v10, %v404_v21 }
 0x12d   : > { %v427_v47 = vmul.f32 1.442695, %v417_v36 }
 0x12e   : > { %v406_v20 = vpop.xlane.xlu2 %405 }
 0x12f   : > { %v418_v5 = vsub.f32 %v1675_v12, %v406_v20  ;;  %v425_v12 = vmul.f32 1.442695, %v416_v9  ;;  %v319_v9 = vld [vmem:[%s2174_s2 + $0x50] sm:$0xff] }
 0x131   : > { %v429_v11 = vmul.f32 1.442695, %v418_v5  ;;  %v320_v5 = vld [vmem:[%s2174_s2 + $0x58] sm:$0xff] }
 0x132   : > { %v410_v61 = vpop.xlane.xlu1 %409 }
 0x133   : > { %1380 = vpow2.f32 %v429_v11  ;;  %v420_v22 = vsub.f32 %v1684_v44, %v410_v61  ;;  %v324_v61 = vld [vmem:[%s2174_s2 + $0x78] sm:$0xff]  ;;  %v318_v11 = vld [vmem:[%s2174_s2 + $0x48] sm:$0xff] }
 0x134   : > { %1382 = vpow2.f32 %v425_v12  ;;  %503 = vmatpush.msra.mxu0 %v324_v61  ;;  %957 = vmatpush.msra.mxu2 %v324_v61 }
 0x135   : > { %1384 = vpow2.f32 %v427_v47  ;;  %v433_v60 = vmul.f32 1.442695, %v420_v22  ;;  %730 = vmatpush.msra.mxu1 %v324_v61  ;;  %1184 = vmatpush.msra.mxu3 %v324_v61  ;;  %v315_v47 = vld [vmem:[%s2174_s2 + $0x30] sm:$0xff] }
 0x136   : > { %v1724_v32 = vpop.xlane.xlu2 %411 }
 0x139   : > { %v1760_v20 = vpop.eup %1380 }
 0x13a   : > { %v1731_v1 = vpop.xlane.xlu0 %413 }
 0x13e   : > { %v1017_v57 = vpop.permute.xlu2 %1016 }
 0x13f   : > { %v1048_v58 = vadd.f32 %v1727_v54, %v1017_v57  ;;  %v431_v57 = vmul.f32 1.442695, %v419_v53  ;;  %v314_v53 = vld [vmem:[%s2174_s2 + $0x28] sm:$0xff] }
 0x141   : > { %v1056_v48 = vmul.f32 0.2, %v1048_v58  ;;  %1386 = vpow2.f32 %v431_v57 }
 0x142   : > { %1388 = vpow2.f32 %v433_v60 }
 0x143   : > { %v1064_v62 = vmax.f32 %v1048_v58, %v1056_v48  ;;  %v1765_v58 = vpop.eup %1382 }
 0x144   : > { %v1771_v59 = vpop.eup %1384 }
 0x145   : > { %v1734_v2 = vadd.f32 %v1064_v62, %v1629_v37 }
 0x146   : > { %v1021_v48 = vpop.permute.xlu2 %1020 }
 0x147   : > { %1080 = vmax.xlane.f32.xlu1 %v1734_v2  ;;  %v1775_v44 = vpop.eup %1386 }
 0x148   : > { %v1778_v55 = vpop.eup %1388 }
 0x14a   : > { %v790_v6 = vpop.permute.xlu1 %789 }
 0x14b   : > { %v821_v8 = vadd.f32 %v1738_v4, %v790_v6 }
 0x14d   : > { %v829_v13 = vmul.f32 0.2, %v821_v8  ;;  %v563_v14 = vpop.permute.xlu0 %562 }
 0x14e   : > { %v594_v33 = vadd.f32 %v1742_v41, %v563_v14  ;;  %v798_v62 = vpop.permute.xlu2 %797 }
 0x14f   : > { %v837_v39 = vmax.f32 %v821_v8, %v829_v13  ;;  %439 = vadd.xlane.f32.xlu1 %v1746_v16  ;;  %v823_v8 = vadd.f32 %v1738_v4, %v798_v62  ;;  %v311_v62 = vld [vmem:[%s2174_s2 + $0x10] sm:$0xff] }
 0x150   : > { %v602_v30 = vmul.f32 0.2, %v594_v33 }
 0x151   : > { %v1752_v18 = vadd.f32 %v837_v39, %v1629_v37  ;;  %v317_v39 = vld [vmem:[%s2174_s2 + $0x40] sm:$0xff] }
 0x152   : > { %v610_v46 = vmax.f32 %v594_v33, %v602_v30  ;;  %v794_v3 = vpop.permute.xlu1 %793  ;;  %v831_v33 = vmul.f32 0.2, %v823_v8  ;;  %v316_v30 = vld [vmem:[%s2174_s2 + $0x38] sm:$0xff] }
 0x153   : > { %853 = vmax.xlane.f32.xlu2 %v1752_v18  ;;  %v822_v51 = vadd.f32 %v1738_v4, %v794_v3 }
 0x154   : > { %v1758_v10 = vadd.f32 %v610_v46, %v1629_v37  ;;  %v839_v46 = vmax.f32 %v823_v8, %v831_v33 }
 0x155   : > { %v830_v19 = vmul.f32 0.2, %v822_v51 }
 0x156   : > { %626 = vmax.xlane.f32.xlu0 %v1758_v10  ;;  %v571_v14 = vpop.permute.xlu2 %570  ;;  %v1832_v60 = vadd.f32 %v839_v46, %v1656_v0 }
 0x157   : > { %v838_v21 = vmax.f32 %v822_v51, %v830_v19  ;;  %445 = vadd.xlane.f32.xlu1 %v1760_v20  ;;  %v596_v3 = vadd.f32 %v1742_v41, %v571_v14  ;;  %v802_v19 = vpop.permute.xlu0 %801 }
 0x159   : > { %v1769_v37 = vadd.f32 %v838_v21, %v1647_v56  ;;  %v604_v21 = vmul.f32 0.2, %v596_v3 }
 0x15b   : > { %441 = vadd.xlane.f32.xlu2 %v1765_v58 }
 0x15e   : > { %443 = vadd.xlane.f32.xlu0 %v1771_v59  ;;  %v575_v57 = vpop.permute.xlu2 %574 }
 0x15f   : > { %855 = vmax.xlane.f32.xlu1 %v1769_v37  ;;  %v814_v33 = vpop.permute.xlu0 %813 }
 0x163   : > { %447 = vadd.xlane.f32.xlu2 %v1775_v44 }
 0x166   : > { %449 = vadd.xlane.f32.xlu0 %v1778_v55 }
 0x178   : > { %805 = vperm.xlu1 %1375, %v1598_v23  }
 0x17a   : > { %1040 = vperm.xlu0 %1373, %v1604_v25  }
 0x17b   : > { %586 = vperm.xlu2 %1374, %v1604_v25   ;;  %v322_v25 = vld [vmem:[%s2174_s2 + $0x68] sm:$0xff] }
 0x180   : > { %809 = vperm.xlu1 %1375, %v1600_v24   ;;  %v323_v24 = vld [vmem:[%s2174_s2 + $0x70] sm:$0xff] }
 0x181   : > { %504 = vmatpush.msra.mxu0 %v323_v24  ;;  %958 = vmatpush.msra.mxu2 %v323_v24 }
 0x182   : > { %1044 = vperm.xlu0 %1373, %v1606_v26   ;;  %731 = vmatpush.msra.mxu1 %v323_v24 }
 0x183   : > { %505 = vmatpush.msra.mxu0 %v322_v25  ;;  %1185 = vmatpush.msra.mxu3 %v323_v24  ;;  %v824_v24 = vadd.f32 %v1738_v4, %v802_v19 }
 0x184   : > { %959 = vmatpush.msra.mxu2 %v322_v25  ;;  %732 = vmatpush.msra.mxu1 %v322_v25 }
 0x185   : > { %1186 = vmatpush.msra.mxu3 %v322_v25  ;;  %506 = vmatpush.msra.mxu0 %v321_v63  ;;  %v312_v25 = vld [vmem:[%s2174_s2 + $0x18] sm:$0xff] }
 0x186   : > { %960 = vmatpush.msra.mxu2 %v321_v63  ;;  %733 = vmatpush.msra.mxu1 %v321_v63 }
 0x187   : > { %1187 = vmatpush.msra.mxu3 %v321_v63  ;;  %507 = vmatpush.msra.mxu0 %v320_v5  ;;  %v832_v63 = vmul.f32 0.2, %v824_v24 }
 0x188   : > { %817 = vperm.xlu1 %1375, %v1606_v26   ;;  %961 = vmatpush.msra.mxu2 %v320_v5 }
 0x189   : > { %734 = vmatpush.msra.mxu1 %v320_v5  ;;  %1188 = vmatpush.msra.mxu3 %v320_v5  ;;  %v840_v14 = vmax.f32 %v824_v24, %v832_v63 }
 0x18a   : > { %1376 = vset.pattern.permute.xlu0 %v1516_v34  ;;  %v567_v34 = vpop.permute.xlu1 %566  ;;  %508 = vmatpush.msra.mxu0 %v319_v9 }
 0x18b   : > { %578 = vperm.xlu0 %1376, %v1598_v23   ;;  %v1049_v23 = vadd.f32 %v1727_v54, %v1021_v48  ;;  %962 = vmatpush.msra.mxu2 %v319_v9  ;;  %v595_v12 = vadd.f32 %v1742_v41, %v567_v34  ;;  %v313_v48 = vld [vmem:[%s2174_s2 + $0x20] sm:$0xff]  ;;  %v612_v34 = vmax.f32 %v596_v3, %v604_v21 }
 0x18c   : > { %735 = vmatpush.msra.mxu1 %v319_v9  ;;  %1189 = vmatpush.msra.mxu3 %v319_v9  ;;  %v827_v3 = vadd.f32 %v1738_v4, %v814_v33 }
 0x18d   : > { %509 = vmatpush.msra.mxu0 %v318_v11  ;;  %963 = vmatpush.msra.mxu2 %v318_v11  ;;  %v603_v51 = vmul.f32 0.2, %v595_v12 }
 0x18e   : > { %736 = vmatpush.msra.mxu1 %v318_v11  ;;  %1190 = vmatpush.msra.mxu3 %v318_v11  ;;  %v1857_v11 = vadd.f32 %v612_v34, %v1656_v0 }
 0x18f   : > { %510 = vmatpush.msra.mxu0 %v317_v39  ;;  %964 = vmatpush.msra.mxu2 %v317_v39  ;;  %v611_v61 = vmax.f32 %v595_v12, %v603_v51  ;;  %v1033_v12 = vpop.permute.xlu2 %1032  ;;  %v1867_v51 = vadd.f32 %v840_v14, %v1663_v7 }
 0x190   : > { %737 = vmatpush.msra.mxu1 %v317_v39  ;;  %1191 = vmatpush.msra.mxu3 %v317_v39  ;;  %v597_v39 = vadd.f32 %v1742_v41, %v575_v57  ;;  %v1052_v57 = vadd.f32 %v1727_v54, %v1033_v12 }
 0x191   : > { %511 = vmatpush.msra.mxu0 %v316_v30  ;;  %965 = vmatpush.msra.mxu2 %v316_v30  ;;  %v1848_v5 = vadd.f32 %v611_v61, %v1647_v56 }
 0x192   : > { %v1025_v13 = vpop.permute.xlu1 %1024  ;;  %738 = vmatpush.msra.mxu1 %v316_v30  ;;  %1192 = vmatpush.msra.mxu3 %v316_v30  ;;  %v1060_v24 = vmul.f32 0.2, %v1052_v57 }
 0x193   : > { %590 = vperm.xlu0 %1376, %v1606_v26   ;;  %v1057_v26 = vmul.f32 0.2, %v1049_v23  ;;  %512 = vmatpush.msra.mxu0 %v315_v47 }
 0x194   : > { %966 = vmatpush.msra.mxu2 %v315_v47  ;;  %739 = vmatpush.msra.mxu1 %v315_v47 }
 0x195   : > { %v1065_v6 = vmax.f32 %v1049_v23, %v1057_v26  ;;  %513 = vmatpush.msra.mxu0 %v314_v53  ;;  %1193 = vmatpush.msra.mxu3 %v315_v47  ;;  %v1050_v26 = vadd.f32 %v1727_v54, %v1025_v13  ;;  %v605_v47 = vmul.f32 0.2, %v597_v39 }
 0x196   : > { %967 = vmatpush.msra.mxu2 %v314_v53  ;;  %740 = vmatpush.msra.mxu1 %v314_v53 }
 0x197   : > { %v1814_v36 = vadd.f32 %v1065_v6, %v1647_v56  ;;  %514 = vmatpush.msra.mxu0 %v313_v48  ;;  %1194 = vmatpush.msra.mxu3 %v314_v53  ;;  %v310_v6 = vld [vmem:[%s2174_s2 + $0x8] sm:$0xff]  ;;  %v309_v56 = vld [vmem:[%s2174_s2] sm:$0xff]  ;;  %v1058_v13 = vmul.f32 0.2, %v1050_v26  ;;  %v613_v21 = vmax.f32 %v597_v39, %v605_v47 }
 0x198   : > { %968 = vmatpush.msra.mxu2 %v313_v48  ;;  %741 = vmatpush.msra.mxu1 %v313_v48 }
 0x199   : > { %515 = vmatpush.msra.mxu0 %v312_v25  ;;  %1195 = vmatpush.msra.mxu3 %v313_v48  ;;  %v1066_v46 = vmax.f32 %v1050_v26, %v1058_v13  ;;  %v1881_v48 = vpop.permute.xlu2 %1036 }
 0x19a   : > { %v1029_v22 = vpop.permute.xlu1 %1028  ;;  %969 = vmatpush.msra.mxu2 %v312_v25  ;;  %742 = vmatpush.msra.mxu1 %v312_v25 }
 0x19b   : > { %v1051_v23 = vadd.f32 %v1727_v54, %v1029_v22  ;;  %516 = vmatpush.msra.mxu0 %v311_v62  ;;  %1196 = vmatpush.msra.mxu3 %v312_v25  ;;  %v835_v22 = vmul.f32 0.2, %v827_v3  ;;  %v1884_v25 = vadd.f32 %v613_v21, %v1663_v7 }
 0x19c   : > { %970 = vmatpush.msra.mxu2 %v311_v62  ;;  %743 = vmatpush.msra.mxu1 %v311_v62 }
 0x19d   : > { %517 = vmatpush.msra.mxu0 %v310_v6  ;;  %v1059_v8 = vmul.f32 0.2, %v1051_v23  ;;  %1377 = vset.pattern.permute.xlu0 %v1517_v38  ;;  %v1876_v38 = vadd.f32 %v1066_v46, %v1656_v0  ;;  %v843_v61 = vmax.f32 %v827_v3, %v835_v22 }
 0x19e   : > { %971 = vmatpush.msra.mxu2 %v310_v6  ;;  %744 = vmatpush.msra.mxu1 %v310_v6 }
 0x19f   : > { %518 = vmatpush.msra.mxu0 %v309_v56  ;;  %v1067_v30 = vmax.f32 %v1051_v23, %v1059_v8  ;;  %1197 = vmatpush.msra.mxu3 %v311_v62  ;;  %v1888_v34 = vadd.f32 %v843_v61, %v1681_v42  ;;  %v1068_v62 = vmax.f32 %v1052_v57, %v1060_v24 }
 0x1a0   : > { %972 = vmatpush.msra.mxu2 %v309_v56  ;;  %745 = vmatpush.msra.mxu1 %v309_v56 }
 0x1a1   : > { %1198 = vmatpush.msra.mxu3 %v310_v6  ;;  %v1873_v19 = vadd.f32 %v1067_v30, %v1663_v7  ;;  %v1894_v63 = vadd.f32 %v1068_v62, %v1643_v49 }
 0x1a2   : > { %v1853_v9 = vpop.permute.xlu1 %582 }
 0x1a3   : > { %1199 = vmatpush.msra.mxu3 %v309_v56 }
 0x1a4   : > { %1082 = vmax.xlane.f32.xlu2 %v1814_v36 }
 0x1ac   : > { %857 = vmax.xlane.f32.xlu2 %v1832_v60 }
 0x1b2   : > { %628 = vmax.xlane.f32.xlu1 %v1848_v5 }
 0x1b4   : > { %630 = vmax.xlane.f32.xlu2 %v1857_v11 }
 0x1ba   : > { %v1869_v53 = vpop.xlane.xlu1 %1080  ;;  %859 = vmax.xlane.f32.xlu1 %v1867_v51 }
 0x1bc   : > { %1086 = vmax.xlane.f32.xlu2 %v1873_v19 }
 0x1bd   : > { %1084 = vmax.xlane.f32.xlu0 %v1876_v38 }
 0x1c2   : > { %v440_v23 = vpop.xlane.xlu1 %439  ;;  %632 = vmax.xlane.f32.xlu1 %v1884_v25 }
 0x1c3   : > { %v455_v0 = vadd.f32 1e-16, %v440_v23 }
 0x1c5   : > { %1390 = vrcp.f32 %v455_v0  ;;  %865 = vmax.xlane.f32.xlu0 %v1888_v34 }
 0x1c6   : > { %v1891_v26 = vpop.xlane.xlu2 %853 }
 0x1c9   : > { %v1896_v6 = vpop.xlane.xlu0 %626 }
 0x1ca   : > { %1088 = vmax.xlane.f32.xlu1 %v1894_v63  ;;  %v446_v12 = vpop.xlane.xlu1 %445 }
 0x1cb   : > { %v1391_v7 = vpop.eup %1390  ;;  %v458_v3 = vadd.f32 1e-16, %v446_v12 }
 0x1cc   : > { %v471_v8 = vmul.f32 %v1391_v7, %v455_v0 }
 0x1ce   : > { %v479_v56 = vsub.f32 2.0, %v471_v8  ;;  %v442_v13 = vpop.xlane.xlu2 %441 }
 0x1cf   : > { %v456_v14 = vadd.f32 1e-16, %v442_v13 }
 0x1d0   : > { %v487_v33 = vmul.f32 %v1391_v7, %v479_v56 }
 0x1d1   : > { %1392 = vrcp.f32 %v456_v14  ;;  %v444_v39 = vpop.xlane.xlu0 %443 }
 0x1d2   : > { %v457_v30 = vadd.f32 1e-16, %v444_v39  ;;  %v495_v46 = vmul.f32 %v1746_v16, %v487_v33  ;;  %v1902_v39 = vpop.xlane.xlu1 %855 }
 0x1d4   : > { %1394 = vrcp.f32 %v457_v30  ;;  %519 = vmatmul.f32.vlgmr.msra.gmra.mxu0 %v495_v46 }
 0x1d5   : > { %1396 = vrcp.f32 %v458_v3 }
 0x1d6   : > { %v448_v47 = vpop.xlane.xlu2 %447 }
 0x1d7   : > { %v1393_v22 = vpop.eup %1392  ;;  %v459_v0 = vadd.f32 1e-16, %v448_v47 }
 0x1d8   : > { %v472_v21 = vmul.f32 %v1393_v22, %v456_v14 }
 0x1d9   : > { %1398 = vrcp.f32 %v459_v0  ;;  %v450_v14 = vpop.xlane.xlu0 %449 }
 0x1da   : > { %v1395_v57 = vpop.eup %1394  ;;  %v480_v61 = vsub.f32 2.0, %v472_v21  ;;  %v460_v21 = vadd.f32 1e-16, %v450_v14 }
 0x1db   : > { %v473_v24 = vmul.f32 %v1395_v57, %v457_v30  ;;  %v1397_v56 = vpop.eup %1396 }
 0x1dc   : > { %v488_v23 = vmul.f32 %v1393_v22, %v480_v61  ;;  %v474_v33 = vmul.f32 %v1397_v56, %v458_v3  ;;  %1400 = vrcp.f32 %v460_v21 }
 0x1dd   : > { %v481_v62 = vsub.f32 2.0, %v473_v24 }
 0x1de   : > { %v587_v7 = vpop.permute.xlu2 %586  ;;  %v496_v8 = vmul.f32 %v1765_v58, %v488_v23  ;;  %v482_v47 = vsub.f32 2.0, %v474_v33 }
 0x1df   : > { %v600_v13 = vadd.f32 %v1742_v41, %v587_v7  ;;  %v489_v12 = vmul.f32 %v1395_v57, %v481_v62  ;;  %v1399_v58 = vpop.eup %1398 }
 0x1e0   : > { %522 = vmatmul.f32.gmra.mxu0 %v496_v8  ;;  %v475_v61 = vmul.f32 %v1399_v58, %v459_v0  ;;  %v490_v3 = vmul.f32 %v1397_v56, %v482_v47 }
 0x1e1   : > { %v608_v16 = vmul.f32 0.2, %v600_v13  ;;  %v497_v22 = vmul.f32 %v1771_v59, %v489_v12 }
 0x1e2   : > { %v483_v62 = vsub.f32 2.0, %v475_v61  ;;  %v498_v8 = vmul.f32 %v1760_v20, %v490_v3 }
 0x1e3   : > { %v616_v46 = vmax.f32 %v600_v13, %v608_v16  ;;  %v1401_v13 = vpop.eup %1400 }
 0x1e4   : > { %v476_v33 = vmul.f32 %v1401_v13, %v460_v21  ;;  %v491_v12 = vmul.f32 %v1399_v58, %v483_v62 }
 0x1e5   : > { %v1905_v30 = vadd.f32 %v616_v46, %v1681_v42  ;;  %v599_v46 = vadd.f32 %v1742_v41, %v1853_v9 }
 0x1e6   : > { %v499_v20 = vmul.f32 %v1775_v44, %v491_v12 }
 0x1e7   : > { %638 = vmax.xlane.f32.xlu0 %v1905_v30 }
 0x1e8   : > { %525 = vmatmul.f32.gmra.mxu0 %v497_v22  ;;  %v484_v22 = vsub.f32 2.0, %v476_v33  ;;  %v1053_v33 = vadd.f32 %v1727_v54, %v1881_v48 }
 0x1ea   : > { %v806_v24 = vpop.permute.xlu1 %805  ;;  %v492_v58 = vmul.f32 %v1401_v13, %v484_v22 }
 0x1eb   : > { %v825_v23 = vadd.f32 %v1738_v4, %v806_v24  ;;  %v607_v24 = vmul.f32 0.2, %v599_v46 }
 0x1ec   : > { %v1041_v7 = vpop.permute.xlu0 %1040 }
 0x1ed   : > { %v833_v57 = vmul.f32 0.2, %v825_v23  ;;  %v615_v9 = vmax.f32 %v599_v46, %v607_v24 }
 0x1ef   : > { %v841_v16 = vmax.f32 %v825_v23, %v833_v57  ;;  %v869_v57 = vsub.f32 %v1752_v18, %v1891_v26  ;;  %v1061_v26 = vmul.f32 0.2, %v1053_v33 }
 0x1f0   : > { %528 = vmatmul.f32.gmra.mxu0 %v498_v8 }
 0x1f1   : > { %v1912_v59 = vadd.f32 %v841_v16, %v1643_v49  ;;  %v500_v16 = vmul.f32 %v1778_v55, %v492_v58  ;;  %v877_v12 = vmul.f32 1.442695, %v869_v57  ;;  %v642_v55 = vsub.f32 %v1758_v10, %v1896_v6 }
 0x1f2   : > { %v810_v14 = vpop.permute.xlu1 %809  ;;  %v1069_v22 = vmax.f32 %v1053_v33, %v1061_v26 }
 0x1f3   : > { %v826_v0 = vadd.f32 %v1738_v4, %v810_v14  ;;  %861 = vmax.xlane.f32.xlu2 %v1912_v59  ;;  %1402 = vpow2.f32 %v877_v12 }
 0x1f4   : > { %v1045_v56 = vpop.permute.xlu0 %1044  ;;  %v1950_v10 = vadd.f32 %v1069_v22, %v1672_v15 }
 0x1f5   : > { %v834_v47 = vmul.f32 0.2, %v826_v0 }
 0x1f7   : > { %v842_v61 = vmax.f32 %v826_v0, %v834_v47 }
 0x1f8   : > { %531 = vmatmul.f32.gmra.mxu0 %v499_v20  ;;  %v650_v20 = vmul.f32 1.442695, %v642_v55 }
 0x1f9   : > { %v1920_v3 = vadd.f32 %v842_v61, %v1672_v15  ;;  %v1054_v61 = vadd.f32 %v1727_v54, %v1041_v7  ;;  %v1096_v7 = vsub.f32 %v1734_v2, %v1869_v53 }
 0x1fa   : > { %v818_v21 = vpop.permute.xlu1 %817  ;;  %1404 = vpow2.f32 %v650_v20 }
 0x1fb   : > { %v828_v23 = vadd.f32 %v1738_v4, %v818_v21  ;;  %863 = vmax.xlane.f32.xlu1 %v1920_v3  ;;  %v1931_v4 = vadd.f32 %v615_v9, %v1672_v15  ;;  %v1946_v21 = vpop.eup %1402  ;;  %v1104_v15 = vmul.f32 1.442695, %v1096_v7 }
 0x1fd   : > { %v836_v62 = vmul.f32 0.2, %v828_v23  ;;  %v579_v8 = vpop.permute.xlu0 %578 }
 0x1fe   : > { %v598_v44 = vadd.f32 %v1742_v41, %v579_v8 }
 0x1ff   : > { %v844_v14 = vmax.f32 %v828_v23, %v836_v62  ;;  %v1055_v62 = vadd.f32 %v1727_v54, %v1045_v56 }
 0x200   : > { %v606_v13 = vmul.f32 0.2, %v598_v44  ;;  %534 = vmatmul.f32.gmra.mxu0 %v500_v16  ;;  %v1961_v9 = vpop.eup %1404 }
 0x201   : > { %v1934_v0 = vadd.f32 %v844_v14, %v1688_v50  ;;  %v1063_v2 = vmul.f32 0.2, %v1055_v62 }
 0x202   : > { %v614_v18 = vmax.f32 %v598_v44, %v606_v13 }
 0x203   : > { %636 = vmax.xlane.f32.xlu1 %v1931_v4  ;;  %867 = vmax.xlane.f32.xlu0 %v1934_v0 }
 0x204   : > { %v1941_v48 = vadd.f32 %v614_v18, %v1643_v49  ;;  %v870_v49 = vsub.f32 %v1769_v37, %v1902_v39 }
 0x205   : > { %v591_v46 = vpop.permute.xlu0 %590 }
 0x206   : > { %v601_v47 = vadd.f32 %v1742_v41, %v591_v46  ;;  %634 = vmax.xlane.f32.xlu2 %v1941_v48  ;;  %v1062_v41 = vmul.f32 0.2, %v1054_v61  ;;  %v879_v23 = vmul.f32 1.442695, %v870_v49 }
 0x208   : > { %v609_v24 = vmul.f32 0.2, %v601_v47  ;;  %v1070_v57 = vmax.f32 %v1054_v61, %v1062_v41  ;;  %1406 = vpow2.f32 %v879_v23 }
 0x209   : > { %1408 = vpow2.f32 %v1104_v15 }
 0x20a   : > { %v617_v58 = vmax.f32 %v601_v47, %v609_v24  ;;  %v1965_v37 = vadd.f32 %v1070_v57, %v1681_v42  ;;  %v1071_v42 = vmax.f32 %v1055_v62, %v1063_v2 }
 0x20b   : > { %893 = vadd.xlane.f32.xlu1 %v1946_v21 }
 0x20c   : > { %v1955_v6 = vadd.f32 %v617_v58, %v1688_v50  ;;  %v1978_v54 = vadd.f32 %v1071_v42, %v1688_v50 }
 0x20e   : > { %1090 = vmax.xlane.f32.xlu2 %v1950_v10  ;;  %640 = vmax.xlane.f32.xlu0 %v1955_v6  ;;  %v1969_v8 = vpop.eup %1406 }
 0x20f   : > { %v1972_v53 = vpop.eup %1408 }
 0x213   : > { %666 = vadd.xlane.f32.xlu1 %v1961_v9 }
 0x216   : > { %1092 = vmax.xlane.f32.xlu2 %v1965_v37 }
 0x217   : > { %v1083_v39 = vpop.xlane.xlu2 %1082 }
 0x218   : > { %v1097_v44 = vsub.f32 %v1814_v36, %v1083_v39 }
 0x21a   : > { %v1106_v12 = vmul.f32 1.442695, %v1097_v44 }
 0x21b   : > { %895 = vadd.xlane.f32.xlu1 %v1969_v8 }
 0x21e   : > { %1120 = vadd.xlane.f32.xlu2 %v1972_v53 }
 0x21f   : > { %v858_v16 = vpop.xlane.xlu2 %857 }
 0x220   : > { %v871_v33 = vsub.f32 %v1832_v60, %v858_v16 }
 0x222   : > { %v881_v14 = vmul.f32 1.442695, %v871_v33 }
 0x224   : > { %1410 = vpow2.f32 %v881_v14 }
 0x225   : > { %v629_v56 = vpop.xlane.xlu1 %628  ;;  %1412 = vpow2.f32 %v1106_v12 }
 0x226   : > { %v643_v13 = vsub.f32 %v1848_v5, %v629_v56  ;;  %1094 = vmax.xlane.f32.xlu2 %v1978_v54 }
 0x227   : > { %v631_v18 = vpop.xlane.xlu2 %630 }
 0x228   : > { %v652_v26 = vmul.f32 1.442695, %v643_v13  ;;  %v644_v36 = vsub.f32 %v1857_v11, %v631_v18 }
 0x22a   : > { %v1983_v55 = vpop.eup %1410  ;;  %1414 = vpow2.f32 %v652_v26  ;;  %v654_v46 = vmul.f32 1.442695, %v644_v36 }
 0x22b   : > { %897 = vadd.xlane.f32.xlu0 %v1983_v55  ;;  %v1986_v60 = vpop.eup %1412 }
 0x22c   : > { %1416 = vpow2.f32 %v654_v46 }
 0x22d   : > { %v860_v50 = vpop.xlane.xlu1 %859 }
 0x22e   : > { %v872_v47 = vsub.f32 %v1867_v51, %v860_v50  ;;  %1122 = vadd.xlane.f32.xlu2 %v1986_v60 }
 0x22f   : > { %v1087_v61 = vpop.xlane.xlu2 %1086 }
 0x230   : > { %v1990_v5 = vpop.eup %1414  ;;  %v883_v22 = vmul.f32 1.442695, %v872_v47  ;;  %v1085_v20 = vpop.xlane.xlu0 %1084  ;;  %v1099_v58 = vsub.f32 %v1873_v19, %v1087_v61 }
 0x231   : > { %668 = vadd.xlane.f32.xlu1 %v1990_v5  ;;  %v1098_v11 = vsub.f32 %v1876_v38, %v1085_v20 }
 0x232   : > { %1418 = vpow2.f32 %v883_v22  ;;  %v1996_v41 = vpop.eup %1416  ;;  %v1110_v57 = vmul.f32 1.442695, %v1099_v58 }
 0x233   : > { %v1108_v24 = vmul.f32 1.442695, %v1098_v11 }
 0x235   : > { %1420 = vpow2.f32 %v1108_v24  ;;  %v633_v49 = vpop.xlane.xlu1 %632 }
 0x236   : > { %v645_v51 = vsub.f32 %v1884_v25, %v633_v49 }
 0x238   : > { %v1998_v7 = vpop.eup %1418  ;;  %v656_v23 = vmul.f32 1.442695, %v645_v51  ;;  %v866_v14 = vpop.xlane.xlu0 %865  ;;  %v421_v51 = vsub.f32 %v1691_v52, %v1724_v32 }
 0x239   : > { %670 = vadd.xlane.f32.xlu1 %v1996_v41  ;;  %899 = vadd.xlane.f32.xlu0 %v1998_v7  ;;  %v875_v13 = vsub.f32 %v1888_v34, %v866_v14 }
 0x23a   : > { %1422 = vpow2.f32 %v656_v23 }
 0x23b   : > { %v2002_v38 = vpop.eup %1420  ;;  %1424 = vpow2.f32 %v1110_v57  ;;  %v889_v26 = vmul.f32 1.442695, %v875_v13 }
 0x23c   : > { %1124 = vadd.xlane.f32.xlu2 %v2002_v38 }
 0x23d   : > { %v1089_v19 = vpop.xlane.xlu1 %1088 }
 0x23e   : > { %v1100_v15 = vsub.f32 %v1894_v63, %v1089_v19 }
 0x240   : > { %v2006_v25 = vpop.eup %1422  ;;  %v1112_v39 = vmul.f32 1.442695, %v1100_v15 }
 0x241   : > { %672 = vadd.xlane.f32.xlu1 %v2006_v25  ;;  %v2009_v62 = vpop.eup %1424 }
 0x242   : > { %1426 = vpow2.f32 %v1112_v39 }
 0x244   : > { %1126 = vadd.xlane.f32.xlu2 %v2009_v62 }
 0x248   : > { %v2012_v2 = vpop.eup %1426 }
 0x24c   : > { %1128 = vadd.xlane.f32.xlu2 %v2012_v2 }
 0x25a   : > { %v639_v36 = vpop.xlane.xlu0 %638 }
 0x266   : > { %v862_v44 = vpop.xlane.xlu2 %861 }
 0x267   : > { %v873_v16 = vsub.f32 %v1912_v59, %v862_v44  ;;  %v435_v44 = vmul.f32 1.442695, %v421_v51 }
 0x269   : > { %v885_v42 = vmul.f32 1.442695, %v873_v16 }
 0x26b   : > { %1428 = vpow2.f32 %v885_v42 }
 0x26e   : > { %v864_v63 = vpop.xlane.xlu1 %863 }
 0x26f   : > { %v874_v33 = vsub.f32 %v1920_v3, %v864_v63  ;;  %v648_v3 = vsub.f32 %v1905_v30, %v639_v36 }
 0x271   : > { %v2017_v12 = vpop.eup %1428  ;;  %v887_v56 = vmul.f32 1.442695, %v874_v33  ;;  %v662_v34 = vmul.f32 1.442695, %v648_v3 }
 0x272   : > { %901 = vadd.xlane.f32.xlu0 %v2017_v12 }
 0x273   : > { %1430 = vpow2.f32 %v887_v56 }
 0x274   : > { %1432 = vpow2.f32 %v889_v26 }
 0x276   : > { %v637_v18 = vpop.xlane.xlu1 %636 }
 0x277   : > { %v647_v22 = vsub.f32 %v1931_v4, %v637_v18 }
 0x279   : > { %v2021_v46 = vpop.eup %1430  ;;  %v635_v59 = vpop.xlane.xlu2 %634  ;;  %v660_v24 = vmul.f32 1.442695, %v647_v22 }
 0x27a   : > { %v646_v50 = vsub.f32 %v1941_v48, %v635_v59  ;;  %903 = vadd.xlane.f32.xlu0 %v2021_v46  ;;  %v2027_v61 = vpop.eup %1432  ;;  %v422_v48 = vsub.f32 %v1695_v17, %v1731_v1  ;;  %v868_v1 = vpop.xlane.xlu0 %867 }
 0x27b   : > { %v876_v14 = vsub.f32 %v1934_v0, %v868_v1 }
 0x27c   : > { %v658_v47 = vmul.f32 1.442695, %v646_v50  ;;  %v437_v19 = vmul.f32 1.442695, %v422_v48 }
 0x27d   : > { %v891_v50 = vmul.f32 1.442695, %v876_v14 }
 0x27e   : > { %1434 = vpow2.f32 %v658_v47  ;;  %v894_v20 = vpop.xlane.xlu1 %893 }
 0x27f   : > { %v909_v11 = vadd.f32 1e-16, %v894_v20 }
 0x281   : > { %1436 = vrcp.f32 %v909_v11  ;;  %v1091_v58 = vpop.xlane.xlu2 %1090 }
 0x282   : > { %v1101_v49 = vsub.f32 %v1950_v10, %v1091_v58  ;;  %905 = vadd.xlane.f32.xlu0 %v2027_v61  ;;  %1438 = vpow2.f32 %v662_v34  ;;  %v641_v3 = vpop.xlane.xlu0 %640 }
 0x283   : > { %1440 = vpow2.f32 %v660_v24  ;;  %v649_v34 = vsub.f32 %v1955_v6, %v641_v3 }
 0x284   : > { %v2033_v30 = vpop.eup %1434  ;;  %v1114_v4 = vmul.f32 1.442695, %v1101_v49 }
 0x285   : > { %674 = vadd.xlane.f32.xlu1 %v2033_v30  ;;  %v664_v49 = vmul.f32 1.442695, %v649_v34 }
 0x286   : > { %1442 = vpow2.f32 %v1114_v4  ;;  %v667_v23 = vpop.xlane.xlu1 %666 }
 0x287   : > { %v1437_v57 = vpop.eup %1436  ;;  %v682_v10 = vadd.f32 1e-16, %v667_v23 }
 0x288   : > { %v925_v15 = vmul.f32 %v1437_v57, %v909_v11  ;;  %v2038_v39 = vpop.eup %1438 }
 0x289   : > { %1444 = vrcp.f32 %v682_v10  ;;  %v1093_v17 = vpop.xlane.xlu2 %1092  ;;  %v2042_v52 = vpop.eup %1440 }
 0x28a   : > { %v933_v16 = vsub.f32 2.0, %v925_v15  ;;  %v1102_v42 = vsub.f32 %v1965_v37, %v1093_v17  ;;  %678 = vadd.xlane.f32.xlu0 %v2038_v39  ;;  %1446 = vpow2.f32 %v437_v19 }
 0x28b   : > { %1448 = vpow2.f32 %v435_v44 }
 0x28c   : > { %v2044_v32 = vpop.eup %1442  ;;  %v1116_v63 = vmul.f32 1.442695, %v1102_v42  ;;  %v941_v33 = vmul.f32 %v1437_v57, %v933_v16 }
 0x28d   : > { %676 = vadd.xlane.f32.xlu1 %v2042_v52  ;;  %1130 = vadd.xlane.f32.xlu2 %v2044_v32 }
 0x28e   : > { %1450 = vpow2.f32 %v1116_v63  ;;  %v896_v56 = vpop.xlane.xlu1 %895  ;;  %v949_v37 = vmul.f32 %v1946_v21, %v941_v33 }
 0x28f   : > { %v1445_v13 = vpop.eup %1444  ;;  %v910_v18 = vadd.f32 1e-16, %v896_v56 }
 0x290   : > { %v698_v26 = vmul.f32 %v1445_v13, %v682_v10  ;;  %973 = vmatmul.f32.vlgmr.msra.gmra.mxu2 %v949_v37  ;;  %v2050_v36 = vpop.eup %1446 }
 0x291   : > { %1452 = vrcp.f32 %v910_v18  ;;  %v1121_v59 = vpop.xlane.xlu2 %1120  ;;  %v2053_v20 = vpop.eup %1448 }
 0x292   : > { %v706_v47 = vsub.f32 2.0, %v698_v26  ;;  %v1136_v22 = vadd.f32 1e-16, %v1121_v59  ;;  %453 = vadd.xlane.f32.xlu0 %v2050_v36 }
 0x294   : > { %v2055_v0 = vpop.eup %1450  ;;  %1454 = vrcp.f32 %v1136_v22  ;;  %v714_v21 = vmul.f32 %v1445_v13, %v706_v47 }
 0x295   : > { %451 = vadd.xlane.f32.xlu1 %v2053_v20  ;;  %1132 = vadd.xlane.f32.xlu2 %v2055_v0  ;;  %1456 = vpow2.f32 %v891_v50 }
 0x296   : > { %v722_v11 = vmul.f32 %v1961_v9, %v714_v21  ;;  %1458 = vpow2.f32 %v664_v49 }
 0x297   : > { %v1453_v24 = vpop.eup %1452 }
 0x298   : > { %v926_v58 = vmul.f32 %v1453_v24, %v910_v18  ;;  %746 = vmatmul.f32.vlgmr.msra.gmra.mxu1 %v722_v11 }
 0x299   : > { %v1095_v48 = vpop.xlane.xlu2 %1094 }
 0x29a   : > { %v1455_v4 = vpop.eup %1454  ;;  %v934_v51 = vsub.f32 2.0, %v926_v58  ;;  %v1103_v23 = vsub.f32 %v1978_v54, %v1095_v48 }
 0x29b   : > { %v1152_v57 = vmul.f32 %v1455_v4, %v1136_v22  ;;  %v2062_v19 = vpop.eup %1456 }
 0x29c   : > { %v1118_v6 = vmul.f32 1.442695, %v1103_v23  ;;  %v942_v10 = vmul.f32 %v1453_v24, %v934_v51  ;;  %v2067_v63 = vpop.eup %1458 }
 0x29d   : > { %v1160_v15 = vsub.f32 2.0, %v1152_v57  ;;  %907 = vadd.xlane.f32.xlu2 %v2062_v19 }
 0x29e   : > { %1460 = vpow2.f32 %v1118_v6  ;;  %v898_v9 = vpop.xlane.xlu0 %897  ;;  %v950_v44 = vmul.f32 %v1969_v8, %v942_v10 }
 0x29f   : > { %v911_v17 = vadd.f32 1e-16, %v898_v9  ;;  %v1168_v1 = vmul.f32 %v1455_v4, %v1160_v15 }
 0x2a0   : > { %976 = vmatmul.f32.gmra.mxu2 %v950_v44 }
 0x2a1   : > { %1462 = vrcp.f32 %v911_v17  ;;  %v1123_v16 = vpop.xlane.xlu2 %1122  ;;  %v1176_v54 = vmul.f32 %v1972_v53, %v1168_v1 }
 0x2a2   : > { %v1137_v42 = vadd.f32 1e-16, %v1123_v16 }
 0x2a3   : > { %1200 = vmatmul.f32.vlgmr.msra.gmra.mxu3 %v1176_v54 }
 0x2a4   : > { %v2069_v33 = vpop.eup %1460  ;;  %1464 = vrcp.f32 %v1137_v42  ;;  %v669_v14 = vpop.xlane.xlu1 %668 }
 0x2a5   : > { %v683_v56 = vadd.f32 1e-16, %v669_v14  ;;  %1134 = vadd.xlane.f32.xlu1 %v2069_v33  ;;  %680 = vadd.xlane.f32.xlu2 %v2067_v63 }
 0x2a7   : > { %v1463_v8 = vpop.eup %1462  ;;  %1466 = vrcp.f32 %v683_v56 }
 0x2a8   : > { %v927_v37 = vmul.f32 %v1463_v8, %v911_v17 }
 0x2aa   : > { %v1465_v13 = vpop.eup %1464  ;;  %v935_v18 = vsub.f32 2.0, %v927_v37 }
 0x2ab   : > { %v1153_v26 = vmul.f32 %v1465_v13, %v1137_v42 }
 0x2ac   : > { %v671_v53 = vpop.xlane.xlu1 %670  ;;  %v900_v59 = vpop.xlane.xlu0 %899  ;;  %v943_v50 = vmul.f32 %v1463_v8, %v935_v18 }
 0x2ad   : > { %v1467_v3 = vpop.eup %1466  ;;  %v1161_v47 = vsub.f32 2.0, %v1153_v26  ;;  %v684_v22 = vadd.f32 1e-16, %v671_v53  ;;  %v912_v21 = vadd.f32 1e-16, %v900_v59 }
 0x2ae   : > { %v699_v34 = vmul.f32 %v1467_v3, %v683_v56  ;;  %v951_v11 = vmul.f32 %v1983_v55, %v943_v50 }
 0x2af   : > { %1468 = vrcp.f32 %v684_v22  ;;  %v1125_v24 = vpop.xlane.xlu2 %1124  ;;  %v1169_v58 = vmul.f32 %v1465_v13, %v1161_v47 }
 0x2b0   : > { %v707_v49 = vsub.f32 2.0, %v699_v34  ;;  %1470 = vrcp.f32 %v912_v21  ;;  %v1138_v48 = vadd.f32 1e-16, %v1125_v24  ;;  %979 = vmatmul.f32.gmra.mxu2 %v951_v11 }
 0x2b1   : > { %v1177_v4 = vmul.f32 %v1986_v60, %v1169_v58 }
 0x2b2   : > { %1472 = vrcp.f32 %v1138_v48  ;;  %v715_v51 = vmul.f32 %v1467_v3, %v707_v49 }
 0x2b3   : > { %1203 = vmatmul.f32.gmra.mxu3 %v1177_v4 }
 0x2b4   : > { %v673_v23 = vpop.xlane.xlu1 %672  ;;  %v723_v57 = vmul.f32 %v1990_v5, %v715_v51 }
 0x2b5   : > { %v1469_v6 = vpop.eup %1468  ;;  %v685_v10 = vadd.f32 1e-16, %v673_v23 }
 0x2b6   : > { %v1471_v15 = vpop.eup %1470  ;;  %v700_v9 = vmul.f32 %v1469_v6, %v684_v22  ;;  %749 = vmatmul.f32.gmra.mxu1 %v723_v57 }
 0x2b7   : > { %v928_v55 = vmul.f32 %v1471_v15, %v912_v21  ;;  %1474 = vrcp.f32 %v685_v10  ;;  %v1127_v44 = vpop.xlane.xlu2 %1126 }
 0x2b8   : > { %v1473_v17 = vpop.eup %1472  ;;  %v708_v1 = vsub.f32 2.0, %v700_v9  ;;  %v1139_v16 = vadd.f32 1e-16, %v1127_v44 }
 0x2b9   : > { %v936_v54 = vsub.f32 2.0, %v928_v55  ;;  %v1154_v42 = vmul.f32 %v1473_v17, %v1138_v48 }
 0x2ba   : > { %1476 = vrcp.f32 %v1139_v16  ;;  %v716_v60 = vmul.f32 %v1469_v6, %v708_v1 }
 0x2bb   : > { %v1162_v14 = vsub.f32 2.0, %v1154_v42  ;;  %v944_v56 = vmul.f32 %v1471_v15, %v936_v54 }
 0x2bc   : > { %v724_v8 = vmul.f32 %v1996_v41, %v716_v60 }
 0x2bd   : > { %v1475_v5 = vpop.eup %1474  ;;  %v952_v37 = vmul.f32 %v1998_v7, %v944_v56  ;;  %v1170_v13 = vmul.f32 %v1473_v17, %v1162_v14 }
 0x2be   : > { %v701_v18 = vmul.f32 %v1475_v5, %v685_v10  ;;  %752 = vmatmul.f32.gmra.mxu1 %v724_v8 }
 0x2bf   : > { %982 = vmatmul.f32.gmra.mxu2 %v952_v37  ;;  %v1129_v26 = vpop.xlane.xlu2 %1128  ;;  %v1178_v53 = vmul.f32 %v2002_v38, %v1170_v13 }
 0x2c0   : > { %v1477_v59 = vpop.eup %1476  ;;  %v709_v50 = vsub.f32 2.0, %v701_v18  ;;  %v1140_v3 = vadd.f32 1e-16, %v1129_v26 }
 0x2c1   : > { %v1155_v47 = vmul.f32 %v1477_v59, %v1139_v16  ;;  %1206 = vmatmul.f32.gmra.mxu3 %v1178_v53 }
 0x2c2   : > { %1478 = vrcp.f32 %v1140_v3  ;;  %v717_v22 = vmul.f32 %v1475_v5, %v709_v50 }
 0x2c3   : > { %v1163_v21 = vsub.f32 2.0, %v1155_v47 }
 0x2c4   : > { %v725_v41 = vmul.f32 %v2006_v25, %v717_v22 }
 0x2c5   : > { %v1171_v34 = vmul.f32 %v1477_v59, %v1163_v21 }
 0x2c6   : > { %755 = vmatmul.f32.gmra.mxu1 %v725_v41 }
 0x2c7   : > { %v1179_v7 = vmul.f32 %v2009_v62, %v1171_v34 }
 0x2c8   : > { %v1479_v11 = vpop.eup %1478 }
 0x2c9   : > { %v1156_v24 = vmul.f32 %v1479_v11, %v1140_v3  ;;  %1209 = vmatmul.f32.gmra.mxu3 %v1179_v7 }
 0x2cb   : > { %v1164_v58 = vsub.f32 2.0, %v1156_v24 }
 0x2cd   : > { %v1172_v49 = vmul.f32 %v1479_v11, %v1164_v58 }
 0x2cf   : > { %v1180_v38 = vmul.f32 %v2012_v2, %v1172_v49 }
 0x2d1   : > { %1212 = vmatmul.f32.gmra.mxu3 %v1180_v38 }
 0x2e5   : > { %v902_v48 = vpop.xlane.xlu0 %901 }
 0x2e6   : > { %v913_v4 = vadd.f32 1e-16, %v902_v48 }
 0x2e8   : > { %1480 = vrcp.f32 %v913_v4 }
 0x2ed   : > { %v904_v51 = vpop.xlane.xlu0 %903 }
 0x2ee   : > { %v1481_v23 = vpop.eup %1480  ;;  %v914_v57 = vadd.f32 1e-16, %v904_v51 }
 0x2ef   : > { %v929_v6 = vmul.f32 %v1481_v23, %v913_v4 }
 0x2f0   : > { %1482 = vrcp.f32 %v914_v57 }
 0x2f1   : > { %v937_v25 = vsub.f32 2.0, %v929_v6 }
 0x2f3   : > { %v945_v10 = vmul.f32 %v1481_v23, %v937_v25 }
 0x2f5   : > { %v906_v15 = vpop.xlane.xlu0 %905  ;;  %v953_v62 = vmul.f32 %v2017_v12, %v945_v10 }
 0x2f6   : > { %v1483_v9 = vpop.eup %1482  ;;  %v915_v55 = vadd.f32 1e-16, %v906_v15 }
 0x2f7   : > { %v930_v44 = vmul.f32 %v1483_v9, %v914_v57  ;;  %985 = vmatmul.f32.gmra.mxu2 %v953_v62 }
 0x2f8   : > { %1484 = vrcp.f32 %v915_v55  ;;  %v675_v2 = vpop.xlane.xlu1 %674 }
 0x2f9   : > { %v938_v17 = vsub.f32 2.0, %v930_v44  ;;  %v686_v1 = vadd.f32 1e-16, %v675_v2 }
 0x2fb   : > { %1486 = vrcp.f32 %v686_v1  ;;  %v946_v16 = vmul.f32 %v1483_v9, %v938_v17 }
 0x2fd   : > { %v679_v54 = vpop.xlane.xlu0 %678  ;;  %v954_v42 = vmul.f32 %v2021_v46, %v946_v16 }
 0x2fe   : > { %v1485_v60 = vpop.eup %1484  ;;  %v688_v14 = vadd.f32 1e-16, %v679_v54 }
 0x2ff   : > { %v931_v56 = vmul.f32 %v1485_v60, %v915_v55  ;;  %988 = vmatmul.f32.gmra.mxu2 %v954_v42 }
 0x300   : > { %v677_v8 = vpop.xlane.xlu1 %676  ;;  %v1131_v5 = vpop.xlane.xlu2 %1130  ;;  %1488 = vrcp.f32 %v688_v14 }
 0x301   : > { %v1487_v12 = vpop.eup %1486  ;;  %v939_v37 = vsub.f32 2.0, %v931_v56  ;;  %v687_v13 = vadd.f32 1e-16, %v677_v8  ;;  %v1141_v18 = vadd.f32 1e-16, %v1131_v5 }
 0x302   : > { %v702_v26 = vmul.f32 %v1487_v12, %v686_v1 }
 0x303   : > { %1490 = vrcp.f32 %v687_v13  ;;  %v947_v53 = vmul.f32 %v1485_v60, %v939_v37 }
 0x304   : > { %v710_v59 = vsub.f32 2.0, %v702_v26  ;;  %1492 = vrcp.f32 %v1141_v18 }
 0x305   : > { %v454_v50 = vpop.xlane.xlu0 %453  ;;  %v955_v3 = vmul.f32 %v2027_v61, %v947_v53 }
 0x306   : > { %v462_v46 = vadd.f32 1e-16, %v454_v50  ;;  %v718_v47 = vmul.f32 %v1487_v12, %v710_v59  ;;  %v1489_v22 = vpop.eup %1488  ;;  %v520_v50 = vpop.f32.mrf.mxu0 }
 0x307   : > { %991 = vmatmul.f32.gmra.mxu2 %v955_v3  ;;  %v704_v48 = vmul.f32 %v1489_v22, %v688_v14 }
 0x308   : > { %v452_v21 = vpop.xlane.xlu1 %451  ;;  %v1133_v41 = vpop.xlane.xlu2 %1132  ;;  %v726_v34 = vmul.f32 %v2033_v30, %v718_v47  ;;  %1494 = vrcp.f32 %v462_v46 }
 0x309   : > { %v1491_v7 = vpop.eup %1490  ;;  %v461_v11 = vadd.f32 1e-16, %v452_v21  ;;  %v1142_v24 = vadd.f32 1e-16, %v1133_v41  ;;  %v712_v6 = vsub.f32 2.0, %v704_v48 }
 0x30a   : > { %v1493_v58 = vpop.eup %1492  ;;  %v703_v49 = vmul.f32 %v1491_v7, %v687_v13  ;;  %758 = vmatmul.f32.gmra.mxu1 %v726_v34  ;;  %v325_v13 = vld [vmem:[%s2176_s4] sm:$0xf] }
 0x30b   : > { %v1157_v38 = vmul.f32 %v1493_v58, %v1141_v18  ;;  %1496 = vrcp.f32 %v461_v11  ;;  %v720_v1 = vmul.f32 %v1489_v22, %v712_v6  ;;  %v2094_v26 = vperm.slane %v325_v13, 1 }
 0x30c   : > { %v711_v4 = vsub.f32 2.0, %v703_v49  ;;  %1498 = vrcp.f32 %v1142_v24  ;;  %v2096_v59 = vperm.slane %v325_v13, 0  ;;  %v2102_v41 = vperm.slane %v325_v13, 2 }
 0x30d   : > { %v1165_v61 = vsub.f32 2.0, %v1157_v38  ;;  %v728_v8 = vmul.f32 %v2038_v39, %v720_v1  ;;  %v2104_v49 = vperm.slane %v325_v13, 3 }
 0x30e   : > { %v719_v51 = vmul.f32 %v1491_v7, %v711_v4  ;;  %v1495_v57 = vpop.eup %1494  ;;  %v545_v21 = vmul.f32 %v2096_v59, %v520_v50 }
 0x30f   : > { %v1173_v23 = vmul.f32 %v1493_v58, %v1165_v61  ;;  %v478_v2 = vmul.f32 %v1495_v57, %v462_v46 }
 0x310   : > { %v908_v25 = vpop.xlane.xlu2 %907  ;;  %v727_v30 = vmul.f32 %v2042_v52, %v719_v51 }
 0x311   : > { %v1497_v10 = vpop.eup %1496  ;;  %v916_v15 = vadd.f32 1e-16, %v908_v25  ;;  %v1181_v62 = vmul.f32 %v2044_v32, %v1173_v23  ;;  %v486_v60 = vsub.f32 2.0, %v478_v2 }
 0x312   : > { %v1499_v9 = vpop.eup %1498  ;;  %v477_v55 = vmul.f32 %v1497_v10, %v461_v11  ;;  %761 = vmatmul.f32.gmra.mxu1 %v727_v30 }
 0x313   : > { %v1158_v44 = vmul.f32 %v1499_v9, %v1142_v24  ;;  %1500 = vrcp.f32 %v916_v15  ;;  %1215 = vmatmul.f32.gmra.mxu3 %v1181_v62  ;;  %v494_v39 = vmul.f32 %v1495_v57, %v486_v60  ;;  %v974_v7 = vpop.f32.mrf.mxu2 }
 0x314   : > { %v485_v17 = vsub.f32 2.0, %v477_v55 }
 0x315   : > { %v1166_v16 = vsub.f32 2.0, %v1158_v44  ;;  %v502_v46 = vmul.f32 %v2050_v36, %v494_v39  ;;  %v999_v36 = vmul.f32 %v2102_v41, %v974_v7 }
 0x316   : > { %v493_v54 = vmul.f32 %v1497_v10, %v485_v17  ;;  %v523_v10 = vpop.f32.mrf.mxu0 }
 0x317   : > { %v1174_v42 = vmul.f32 %v1499_v9, %v1166_v16 }
 0x318   : > { %v1135_v14 = vpop.xlane.xlu1 %1134  ;;  %v681_v56 = vpop.xlane.xlu2 %680  ;;  %v501_v52 = vmul.f32 %v2053_v20, %v493_v54 }
 0x319   : > { %v1501_v32 = vpop.eup %1500  ;;  %v1143_v5 = vadd.f32 1e-16, %v1135_v14  ;;  %v689_v12 = vadd.f32 1e-16, %v681_v56  ;;  %v1182_v37 = vmul.f32 %v2055_v0, %v1174_v42  ;;  %v747_v20 = vpop.f32.mrf.mxu1 }
 0x31a   : > { %v932_v18 = vmul.f32 %v1501_v32, %v916_v15  ;;  %537 = vmatmul.f32.gmra.mxu0 %v501_v52  ;;  %764 = vmatmul.f32.gmra.mxu1 %v728_v8  ;;  %v772_v0 = vmul.f32 %v2094_v26, %v747_v20 }
 0x31b   : > { %1502 = vrcp.f32 %v1143_v5  ;;  %1218 = vmatmul.f32.gmra.mxu3 %v1182_v37 }
 0x31c   : > { %v940_v53 = vsub.f32 2.0, %v932_v18  ;;  %1504 = vrcp.f32 %v689_v12  ;;  %v780_v24 = vadd.f32 %v772_v0, %v545_v21 }
 0x31e   : > { %v948_v3 = vmul.f32 %v1501_v32, %v940_v53  ;;  %v1007_v61 = vadd.f32 %v999_v36, %v780_v24  ;;  %v526_v1 = vpop.f32.mrf.mxu0 }
 0x31f   : > { %v547_v60 = vmul.f32 %v2096_v59, %v526_v1 }
 0x320   : > { %v956_v47 = vmul.f32 %v2062_v19, %v948_v3 }
 0x321   : > { %v1503_v22 = vpop.eup %1502 }
 0x322   : > { %v1505_v34 = vpop.eup %1504  ;;  %v1159_v11 = vmul.f32 %v1503_v22, %v1143_v5  ;;  %540 = vmatmul.f32.gmra.mxu0 %v502_v46  ;;  %994 = vmatmul.f32.gmra.mxu2 %v956_v47 }
 0x323   : > { %v705_v58 = vmul.f32 %v1505_v34, %v689_v12 }
 0x324   : > { %v1167_v38 = vsub.f32 2.0, %v1159_v11 }
 0x325   : > { %v713_v48 = vsub.f32 2.0, %v705_v58 }
 0x326   : > { %v1201_v19 = vpop.f32.mrf.mxu3  ;;  %v1175_v4 = vmul.f32 %v1503_v22, %v1167_v38  ;;  %v529_v32 = vpop.f32.mrf.mxu0 }
 0x327   : > { %v1226_v51 = vmul.f32 %v2104_v49, %v1201_v19  ;;  %v721_v23 = vmul.f32 %v1505_v34, %v713_v48  ;;  %v548_v13 = vmul.f32 %v2096_v59, %v529_v32 }
 0x328   : > { %v1183_v57 = vmul.f32 %v2069_v33, %v1175_v4  ;;  %v977_v33 = vpop.f32.mrf.mxu2 }
 0x329   : > { %v1234_v6 = vadd.f32 %v1226_v51, %v1007_v61  ;;  %v729_v25 = vmul.f32 %v2067_v63, %v721_v23  ;;  %v546_v63 = vmul.f32 %v2096_v59, %v523_v10  ;;  %v1000_v9 = vmul.f32 %v2102_v41, %v977_v33 }
 0x32a   : > { %1221 = vmatmul.f32.gmra.mxu3 %v1183_v57 }
 0x32b   : > { %v1242_v30 = vmul.f32 %v1234_v6, %v1612_v28  ;;  %767 = vmatmul.f32.gmra.mxu1 %v729_v25 }
 0x32d   : > { %1251 = vst.msk [vmem:[%s2115_s22] sm:$0xff] %vm1250_vm0, %v1242_v30 }
 0x32e   : > { %v532_v21 = vpop.f32.mrf.mxu0 }
 0x32f   : > { %v549_v11 = vmul.f32 %v2096_v59, %v532_v21 }
 0x333   : > { %v750_v15 = vpop.f32.mrf.mxu1  ;;  %v980_v14 = vpop.f32.mrf.mxu2 }
 0x334   : > { %v773_v62 = vmul.f32 %v2094_v26, %v750_v15  ;;  %v1001_v52 = vmul.f32 %v2102_v41, %v980_v14 }
 0x336   : > { %v781_v55 = vadd.f32 %v773_v62, %v546_v63  ;;  %v1204_v44 = vpop.f32.mrf.mxu3  ;;  %v535_v19 = vpop.f32.mrf.mxu0 }
 0x337   : > { %v1227_v2 = vmul.f32 %v2104_v49, %v1204_v44  ;;  %v550_v57 = vmul.f32 %v2096_v59, %v535_v19 }
 0x338   : > { %v1008_v17 = vadd.f32 %v1000_v9, %v781_v55 }
 0x33a   : > { %v1235_v28 = vadd.f32 %v1227_v2, %v1008_v17 }
 0x33b   : > { %v753_v16 = vpop.f32.mrf.mxu1 }
 0x33c   : > { %v1243_v54 = vmul.f32 %v1235_v28, %v1626_v35  ;;  %v774_v42 = vmul.f32 %v2094_v26, %v753_v16 }
 0x33e   : > { %1252 = vst.msk [vmem:[%s2115_s22 + $0x8] sm:$0xff] %vm1250_vm0, %v1243_v54  ;;  %v782_v56 = vadd.f32 %v774_v42, %v547_v60 }
 0x340   : > { %v1009_v37 = vadd.f32 %v1001_v52, %v782_v56 }
 0x342   : > { %v983_v53 = vpop.f32.mrf.mxu2 }
 0x343   : > { %v756_v8 = vpop.f32.mrf.mxu1  ;;  %v1002_v50 = vmul.f32 %v2102_v41, %v983_v53 }
 0x344   : > { %v1207_v5 = vpop.f32.mrf.mxu3  ;;  %v775_v12 = vmul.f32 %v2094_v26, %v756_v8 }
 0x345   : > { %v1228_v35 = vmul.f32 %v2104_v49, %v1207_v5 }
 0x346   : > { %v783_v20 = vadd.f32 %v775_v12, %v548_v13 }
 0x347   : > { %v1236_v18 = vadd.f32 %v1228_v35, %v1009_v37 }
 0x348   : > { %v1010_v0 = vadd.f32 %v1002_v50, %v783_v20 }
 0x349   : > { %v1244_v39 = vmul.f32 %v1236_v18, %v1621_v31 }
 0x34b   : > { %1253 = vst.msk [vmem:[%s2115_s22 + $0x10] sm:$0xff] %vm1250_vm0, %v1244_v39 }
 0x34c   : > { %v1210_v3 = vpop.f32.mrf.mxu3 }
 0x34d   : > { %v1229_v46 = vmul.f32 %v2104_v49, %v1210_v3 }
 0x34f   : > { %v1237_v47 = vadd.f32 %v1229_v46, %v1010_v0 }
 0x351   : > { %v1245_v22 = vmul.f32 %v1237_v47, %v1631_v40 }
 0x353   : > { %1254 = vst.msk [vmem:[%s2115_s22 + $0x18] sm:$0xff] %vm1250_vm0, %v1245_v22 }
 0x354   : > { %v1213_v24 = vpop.f32.mrf.mxu3 }
 0x355   : > { %v1230_v36 = vmul.f32 %v2104_v49, %v1213_v24 }
 0x37a   : > { %v986_v34 = vpop.f32.mrf.mxu2 }
 0x37b   : > { %v1003_v58 = vmul.f32 %v2102_v41, %v986_v34 }
 0x382   : > { %v989_v61 = vpop.f32.mrf.mxu2 }
 0x383   : > { %v1004_v25 = vmul.f32 %v2102_v41, %v989_v61 }
 0x387   : > { %v759_v7 = vpop.f32.mrf.mxu1 }
 0x388   : > { %v776_v31 = vmul.f32 %v2094_v26, %v759_v7 }
 0x38a   : > { %v784_v38 = vadd.f32 %v776_v31, %v549_v11  ;;  %v992_v55 = vpop.f32.mrf.mxu2 }
 0x38b   : > { %v1005_v17 = vmul.f32 %v2102_v41, %v992_v55 }
 0x38c   : > { %v1011_v48 = vadd.f32 %v1003_v58, %v784_v38 }
 0x38e   : > { %v1238_v4 = vadd.f32 %v1230_v36, %v1011_v48 }
 0x38f   : > { %v762_v40 = vpop.f32.mrf.mxu1 }
 0x390   : > { %v1246_v51 = vmul.f32 %v1238_v4, %v1610_v27  ;;  %v777_v23 = vmul.f32 %v2094_v26, %v762_v40 }
 0x392   : > { %1255 = vst.msk [vmem:[%s2115_s22 + $0x20] sm:$0xff] %vm1250_vm0, %v1246_v51  ;;  %v785_v6 = vadd.f32 %v777_v23, %v550_v57 }
 0x394   : > { %v1012_v10 = vadd.f32 %v1004_v25, %v785_v6 }
 0x396   : > { %v1216_v30 = vpop.f32.mrf.mxu3 }
 0x397   : > { %v1231_v33 = vmul.f32 %v2104_v49, %v1216_v30  ;;  %v538_v15 = vpop.f32.mrf.mxu0  ;;  %v765_v63 = vpop.f32.mrf.mxu1 }
 0x398   : > { %v551_v62 = vmul.f32 %v2096_v59, %v538_v15  ;;  %v778_v27 = vmul.f32 %v2094_v26, %v765_v63 }
 0x399   : > { %v1239_v9 = vadd.f32 %v1231_v33, %v1012_v10 }
 0x39a   : > { %v786_v2 = vadd.f32 %v778_v27, %v551_v62 }
 0x39b   : > { %v1247_v44 = vmul.f32 %v1239_v9, %v1614_v29 }
 0x39c   : > { %v1013_v28 = vadd.f32 %v1005_v17, %v786_v2 }
 0x39d   : > { %1256 = vst.msk [vmem:[%s2115_s22 + $0x28] sm:$0xff] %vm1250_vm0, %v1247_v44 }
 0x39e   : > { %v1219_v1 = vpop.f32.mrf.mxu3 }
 0x39f   : > { %v1232_v16 = vmul.f32 %v2104_v49, %v1219_v1  ;;  %v541_v60 = vpop.f32.mrf.mxu0 }
 0x3a0   : > { %v552_v56 = vmul.f32 %v2096_v59, %v541_v60 }
 0x3a1   : > { %v1240_v54 = vadd.f32 %v1232_v16, %v1013_v28 }
 0x3a3   : > { %v1248_v42 = vmul.f32 %v1240_v54, %v1637_v43 }
 0x3a5   : > { %1257 = vst.msk [vmem:[%s2115_s22 + $0x30] sm:$0xff] %vm1250_vm0, %v1248_v42  ;;  %v995_v29 = vpop.f32.mrf.mxu2 }
 0x3a6   : > { %v1006_v32 = vmul.f32 %v2102_v41, %v995_v29 }
 0x3a8   : > { %v768_v14 = vpop.f32.mrf.mxu1 }
 0x3a9   : > { %v779_v52 = vmul.f32 %v2094_v26, %v768_v14 }
 0x3ab   : > { %v787_v8 = vadd.f32 %v779_v52, %v552_v56 }
 0x3ad   : > { %v1222_v5 = vpop.f32.mrf.mxu3  ;;  %v1014_v12 = vadd.f32 %v1006_v32, %v787_v8 }
 0x3ae   : > { %v1233_v37 = vmul.f32 %v2104_v49, %v1222_v5 }
 0x3b0   : > { %v1241_v35 = vadd.f32 %v1233_v37, %v1014_v12 }
 0x3b2   : > { %v1249_v13 = vmul.f32 %v1241_v35, %v1639_v45 }
 0x3b4   : > { %1258 = vst.msk [vmem:[%s2115_s22 + $0x38] sm:$0xff] %vm1250_vm0, %v1249_v13 }
 0x3b5 PF: > { %s15_s18 = sadd.s32 1, %s1512_s18  }
 0x3b6   : > { %p12_p5 = scmp.ge.s32.totalorder %s15_s18, 4  }
 0x3b8   :  { %14 = sbr.rel (!%p12_p5) target bundleno = 1 (0x1), region = 73 }

</bundles_post_ra>
